<compile_context>
chip_gen: v7x
topology: tpu7x:2x2x1
jax: 0.10.0
libtpu: 0.0.40
codegen_flags: <defaults>
</compile_context>

<pallas_src>
import numpy as np
import jax
import jax.numpy as jnp
from jax.experimental import pallas as pl
from jax.experimental.pallas import tpu as pltpu

H = 128            # hidden_size (small, lane-aligned; module default is 256)
NUM_LAYERS = 3
NUM_DIRS = 2       # bidirectional=True
VOCAB = 64         # input_size of the embedding


def bigru_step_kernel(x_ref, h0_ref, wih0_ref, wih12_ref, whh_ref,
                      brzn_ref, bhn_ref, ctx_ref, hn_ref):
    """One time-step of a stacked bidirectional GRU (seq_len == 1, batch == 1).

    Operand layout (all hidden dims on the lane axis, gate order r, z, n):
      x      : (1, H)        f32   embedded token
      h0     : (6, H)        f32   rows = (layer, direction) as in PyTorch
      wih0   : (H, 6H)       bf16  layer-0 input weights, cols [fwd r,z,n | bwd r,z,n]
      wih12  : (2, 2H, 6H)   bf16  layers 1..2 input weights (input = concat of dirs)
      whh    : (6, H, 3H)    bf16  per-cell hidden weights
      brzn   : (3, 1, 6H)    f32   per layer: [b_ir+b_hr, b_iz+b_hz, b_in] x {fwd,bwd}
      bhn    : (3, 1, 2H)    f32   per layer: [b_hn_fwd | b_hn_bwd]
    """
    x = x_ref[...]                                           # (1, H) f32
    h_rows = []
    for layer in range(NUM_LAYERS):
        x_bf = x.astype(jnp.bfloat16)
        w_in = wih0_ref[...] if layer == 0 else wih12_ref[layer - 1]
        # fused input matmul for both directions: (1, K) x (K, 6H)
        gi = jnp.dot(x_bf, w_in,
                     preferred_element_type=jnp.float32) + brzn_ref[layer]   # (1, 6H)
        bhn = bhn_ref[layer]                                  # (1, 2H)

        # hidden-side dots, both directions issued back-to-back (independent pushes)
        h_fwd = h0_ref[2 * layer:2 * layer + 1, :]            # (1, H)
        h_bwd = h0_ref[2 * layer + 1:2 * layer + 2, :]
        gh_fwd = jnp.dot(h_fwd.astype(jnp.bfloat16), whh_ref[2 * layer],
                         preferred_element_type=jnp.float32)  # (1, 3H)
        gh_bwd = jnp.dot(h_bwd.astype(jnp.bfloat16), whh_ref[2 * layer + 1],
                         preferred_element_type=jnp.float32)

        outs = []
        for d, (gh, h_prev) in enumerate(((gh_fwd, h_fwd), (gh_bwd, h_bwd))):
            gid = gi[:, d * 3 * H:(d + 1) * 3 * H]            # (1, 3H)
            i_r, i_z, i_n = gid[:, :H], gid[:, H:2 * H], gid[:, 2 * H:]
            h_r, h_z = gh[:, :H], gh[:, H:2 * H]
            h_n = gh[:, 2 * H:] + bhn[:, d * H:(d + 1) * H]
            r = jax.nn.sigmoid(i_r + h_r)                     # r/z biases pre-summed
            z = jax.nn.sigmoid(i_z + h_z)
            n = jnp.tanh(i_n + r * h_n)
            h_new = (1.0 - z) * n + z * h_prev                # (1, H) f32
            outs.append(h_new)
        h_rows.extend(outs)
        x = jnp.concatenate(outs, axis=1)                     # (1, 2H) next-layer input

    ctx_ref[...] = x                                          # top-layer output
    hn_ref[...] = jnp.concatenate(h_rows, axis=0)             # single (6, H) store


@jax.jit
def encoder_rnn_forward(token, hidden, params):
    """Equivalent of EncoderRNN.forward(input, hidden)."""
    emb = params["embedding"][token].reshape(1, H)            # nn.Embedding lookup
    h0 = hidden.reshape(NUM_DIRS * NUM_LAYERS, H)

    vmem = pl.BlockSpec(memory_space=pltpu.MemorySpace.VMEM)
    flops = 2 * H * 6 * H + 2 * 2 * (2 * H) * (6 * H) + 6 * 2 * H * (3 * H)
    weight_bytes = 2 * (H * 6 * H + 2 * (2 * H) * (6 * H) + 6 * H * (3 * H))   # bf16
    other_bytes = 4 * (3 * 6 * H + 3 * 2 * H) + 4 * (H + 6 * H + 2 * H + 6 * H)
    cost = pl.CostEstimate(flops=flops,
                           transcendentals=6 * 3 * H,
                           bytes_accessed=weight_bytes + other_bytes)

    ctx, hn = pl.pallas_call(
        bigru_step_kernel,
        out_shape=(jax.ShapeDtypeStruct((1, 2 * H), jnp.float32),
                   jax.ShapeDtypeStruct((NUM_DIRS * NUM_LAYERS, H), jnp.float32)),
        in_specs=[vmem] * 7,
        out_specs=(vmem, vmem),
        input_output_aliases={1: 1},        # h0 updated in place -> h_n
        cost_estimate=cost,
    )(emb, h0, params["wih0"], params["wih12"], params["whh"],
      params["b_rzn"], params["b_hn"])

    context_vector = ctx.reshape(1, 1, NUM_DIRS * H)          # (1, 1, 2H)
    hidden_out = hn.reshape(NUM_DIRS * NUM_LAYERS, 1, H)      # (2L, 1, H)
    return context_vector, hidden_out


def init_params(key):
    """Deterministic init mirroring nn.Embedding / nn.GRU; repacks for the kernel."""
    n_cells = NUM_LAYERS * NUM_DIRS
    keys = jax.random.split(key, 1 + 4 * n_cells)
    emb = jax.random.normal(keys[0], (VOCAB, H), jnp.float32)
    k = 1.0 / np.sqrt(H)

    raw = []
    ki = 1
    for layer in range(NUM_LAYERS):
        in_dim = H if layer == 0 else NUM_DIRS * H
        for _ in range(NUM_DIRS):
            w_ih = jax.random.uniform(keys[ki], (3 * H, in_dim), jnp.float32, -k, k); ki += 1
            w_hh = jax.random.uniform(keys[ki], (3 * H, H), jnp.float32, -k, k);      ki += 1
            b_ih = jax.random.uniform(keys[ki], (3 * H,), jnp.float32, -k, k);        ki += 1
            b_hh = jax.random.uniform(keys[ki], (3 * H,), jnp.float32, -k, k);        ki += 1
            raw.append((w_ih, w_hh, b_ih, b_hh))

    wih_fused, whh_t, b_rzn, b_hn = [], [], [], []
    for layer in range(NUM_LAYERS):
        wl, bl_rzn, bl_hn = [], [], []
        for d in range(NUM_DIRS):
            w_ih, w_hh, b_ih, b_hh = raw[NUM_DIRS * layer + d]
            wl.append(w_ih.T)                                 # (in_dim, 3H)
            whh_t.append(w_hh.T.astype(jnp.bfloat16))         # (H, 3H) bf16
            b_ir, b_iz, b_in = b_ih[:H], b_ih[H:2 * H], b_ih[2 * H:]
            b_hr, b_hz, b_hn_ = b_hh[:H], b_hh[H:2 * H], b_hh[2 * H:]
            bl_rzn.append(jnp.concatenate([b_ir + b_hr, b_iz + b_hz, b_in]))
            bl_hn.append(b_hn_)
        wih_fused.append(jnp.concatenate(wl, axis=1).astype(jnp.bfloat16))  # (in_dim, 6H)
        b_rzn.append(jnp.concatenate(bl_rzn).reshape(1, 6 * H))
        b_hn.append(jnp.concatenate(bl_hn).reshape(1, 2 * H))

    params = {
        "embedding": emb,                                     # (VOCAB, H) f32
        "wih0": wih_fused[0],                                 # (H, 6H)   bf16
        "wih12": jnp.stack(wih_fused[1:]),                    # (2, 2H, 6H) bf16
        "whh": jnp.stack(whh_t),                              # (6, H, 3H)  bf16
        "b_rzn": jnp.stack(b_rzn),                            # (3, 1, 6H)  f32
        "b_hn": jnp.stack(b_hn),                              # (3, 1, 2H)  f32
    }
    return params, raw


def reference_forward(token, hidden, params, raw):
    """Pure-jnp reference replicating torch nn.GRU math with bf16-rounded weights
    and activations (same rounding the kernel applies before each MXU dot)."""
    def bdot(a, w):
        return jnp.dot(a.astype(jnp.bfloat16).astype(jnp.float32),
                       w.astype(jnp.bfloat16).astype(jnp.float32))

    x = params["embedding"][token].reshape(1, H)
    h0 = hidden.reshape(NUM_DIRS * NUM_LAYERS, H)
    hn = []
    inp = x
    for layer in range(NUM_LAYERS):
        outs = []
        for d in range(NUM_DIRS):
            idx = NUM_DIRS * layer + d
            w_ih, w_hh, b_ih, b_hh = raw[idx]
            h = h0[idx:idx + 1]
            gi = bdot(inp, w_ih.T) + b_ih
            gh = bdot(h, w_hh.T) + b_hh
            i_r, i_z, i_n = gi[:, :H], gi[:, H:2 * H], gi[:, 2 * H:]
            h_r, h_z, h_n = gh[:, :H], gh[:, H:2 * H], gh[:, 2 * H:]
            r = jax.nn.sigmoid(i_r + h_r)
            z = jax.nn.sigmoid(i_z + h_z)
            n = jnp.tanh(i_n + r * h_n)
            h_new = (1.0 - z) * n + z * h
            outs.append(h_new)
            hn.append(h_new)
        inp = jnp.concatenate(outs, axis=1)
    return inp.reshape(1, 1, NUM_DIRS * H), jnp.concatenate(hn, 0).reshape(-1, 1, H)


if __name__ == "__main__":
    key = jax.random.PRNGKey(0)
    pkey, tkey, hkey = jax.random.split(key, 3)

    params, raw = init_params(pkey)
    token = jax.random.randint(tkey, (), 0, VOCAB)                        # single token index
    hidden = 0.1 * jax.random.normal(hkey, (NUM_DIRS * NUM_LAYERS, 1, H),
                                     jnp.float32)                         # like initHidden() shape

    ctx, hid = encoder_rnn_forward(token, hidden, params)
    jax.block_until_ready((ctx, hid))

    ctx_ref, hid_ref = reference_forward(token, hidden, params, raw)
    assert ctx.shape == (1, 1, NUM_DIRS * H) and hid.shape == (NUM_DIRS * NUM_LAYERS, 1, H)
    np.testing.assert_allclose(np.asarray(ctx), np.asarray(ctx_ref), rtol=1e-4, atol=1e-4)
    np.testing.assert_allclose(np.asarray(hid), np.asarray(hid_ref), rtol=1e-4, atol=1e-4)

    print("KERNEL_OK")
</pallas_src>

<mosaic_0001>
module attributes {stable_mosaic.version = 11 : i64} {
  func.func @bigru_step_kernel(%arg0: memref<1x128xf32, #tpu.memory_space<vmem>>, %arg1: memref<6x128xf32, #tpu.memory_space<vmem>>, %arg2: memref<128x768xbf16, #tpu.memory_space<vmem>>, %arg3: memref<2x256x768xbf16, #tpu.memory_space<vmem>>, %arg4: memref<6x128x384xbf16, #tpu.memory_space<vmem>>, %arg5: memref<3x1x768xf32, #tpu.memory_space<vmem>>, %arg6: memref<3x1x256xf32, #tpu.memory_space<vmem>>, %arg7: memref<1x256xf32, #tpu.memory_space<vmem>>, %arg8: memref<6x128xf32, #tpu.memory_space<vmem>>) attributes {dimension_semantics = [], scalar_prefetch = 0 : i64, scratch_operands = 0 : i64, tpu.core_type = #tpu.core_type<tc>} {
    %c0 = arith.constant 0 : index
    %c0_0 = arith.constant 0 : index
    %0 = vector.load %arg0[%c0, %c0_0] : memref<1x128xf32, #tpu.memory_space<vmem>>, vector<1x128xf32>
    %1 = arith.truncf %0 : vector<1x128xf32> to vector<1x128xbf16>
    %c0_1 = arith.constant 0 : index
    %c0_2 = arith.constant 0 : index
    %2 = vector.load %arg2[%c0_1, %c0_2] : memref<128x768xbf16, #tpu.memory_space<vmem>>, vector<128x768xbf16>
    %cst = arith.constant dense<0.000000e+00> : vector<1x768xf32>
    %3 = tpu.matmul %1, %2, %cst {dimension_numbers = #tpu.dot_dimension_numbers<[1], [0], [0], [1], [0, 0, 1, 1], [], []>} : vector<1x128xbf16>, vector<128x768xbf16>, vector<1x768xf32> -> vector<1x768xf32>
    %c0_3 = arith.constant 0 : index
    %c0_4 = arith.constant 0 : index
    %c0_5 = arith.constant 0 : index
    %4 = vector.load %arg5[%c0_3, %c0_4, %c0_5] : memref<3x1x768xf32, #tpu.memory_space<vmem>>, vector<1x1x768xf32>
    %5 = vector.shape_cast %4 : vector<1x1x768xf32> to vector<1x768xf32>
    %6 = arith.addf %3, %5 : vector<1x768xf32>
    %c0_6 = arith.constant 0 : index
    %c0_7 = arith.constant 0 : index
    %c0_8 = arith.constant 0 : index
    %7 = vector.load %arg6[%c0_6, %c0_7, %c0_8] : memref<3x1x256xf32, #tpu.memory_space<vmem>>, vector<1x1x256xf32>
    %8 = vector.shape_cast %7 : vector<1x1x256xf32> to vector<1x256xf32>
    %c0_9 = arith.constant 0 : index
    %c0_10 = arith.constant 0 : index
    %9 = vector.load %arg1[%c0_9, %c0_10] : memref<6x128xf32, #tpu.memory_space<vmem>>, vector<1x128xf32>
    %c1 = arith.constant 1 : index
    %c0_11 = arith.constant 0 : index
    %10 = vector.load %arg1[%c1, %c0_11] : memref<6x128xf32, #tpu.memory_space<vmem>>, vector<1x128xf32>
    %11 = arith.truncf %9 : vector<1x128xf32> to vector<1x128xbf16>
    %c0_12 = arith.constant 0 : index
    %c0_13 = arith.constant 0 : index
    %c0_14 = arith.constant 0 : index
    %12 = vector.load %arg4[%c0_12, %c0_13, %c0_14] : memref<6x128x384xbf16, #tpu.memory_space<vmem>>, vector<1x128x384xbf16>
    %13 = vector.shape_cast %12 : vector<1x128x384xbf16> to vector<128x384xbf16>
    %cst_15 = arith.constant dense<0.000000e+00> : vector<1x384xf32>
    %14 = tpu.matmul %11, %13, %cst_15 {dimension_numbers = #tpu.dot_dimension_numbers<[1], [0], [0], [1], [0, 0, 1, 1], [], []>} : vector<1x128xbf16>, vector<128x384xbf16>, vector<1x384xf32> -> vector<1x384xf32>
    %15 = arith.truncf %10 : vector<1x128xf32> to vector<1x128xbf16>
    %c1_16 = arith.constant 1 : index
    %c0_17 = arith.constant 0 : index
    %c0_18 = arith.constant 0 : index
    %16 = vector.load %arg4[%c1_16, %c0_17, %c0_18] : memref<6x128x384xbf16, #tpu.memory_space<vmem>>, vector<1x128x384xbf16>
    %17 = vector.shape_cast %16 : vector<1x128x384xbf16> to vector<128x384xbf16>
    %cst_19 = arith.constant dense<0.000000e+00> : vector<1x384xf32>
    %18 = tpu.matmul %15, %17, %cst_19 {dimension_numbers = #tpu.dot_dimension_numbers<[1], [0], [0], [1], [0, 0, 1, 1], [], []>} : vector<1x128xbf16>, vector<128x384xbf16>, vector<1x384xf32> -> vector<1x384xf32>
    %19 = vector.extract_strided_slice %6 {offsets = [0, 0], sizes = [1, 384], strides = [1, 1]} : vector<1x768xf32> to vector<1x384xf32>
    %20 = vector.extract_strided_slice %19 {offsets = [0, 0], sizes = [1, 128], strides = [1, 1]} : vector<1x384xf32> to vector<1x128xf32>
    %21 = vector.extract_strided_slice %19 {offsets = [0, 128], sizes = [1, 128], strides = [1, 1]} : vector<1x384xf32> to vector<1x128xf32>
    %22 = vector.extract_strided_slice %19 {offsets = [0, 256], sizes = [1, 128], strides = [1, 1]} : vector<1x384xf32> to vector<1x128xf32>
    %23 = vector.extract_strided_slice %14 {offsets = [0, 0], sizes = [1, 128], strides = [1, 1]} : vector<1x384xf32> to vector<1x128xf32>
    %24 = vector.extract_strided_slice %14 {offsets = [0, 128], sizes = [1, 128], strides = [1, 1]} : vector<1x384xf32> to vector<1x128xf32>
    %25 = vector.extract_strided_slice %14 {offsets = [0, 256], sizes = [1, 128], strides = [1, 1]} : vector<1x384xf32> to vector<1x128xf32>
    %26 = vector.extract_strided_slice %8 {offsets = [0, 0], sizes = [1, 128], strides = [1, 1]} : vector<1x256xf32> to vector<1x128xf32>
    %27 = arith.addf %25, %26 : vector<1x128xf32>
    %28 = arith.addf %20, %23 : vector<1x128xf32>
    %29 = arith.negf %28 : vector<1x128xf32>
    %30 = math.exp %29 : vector<1x128xf32>
    %cst_20 = arith.constant 1.000000e+00 : f32
    %31 = vector.broadcast %cst_20 : f32 to vector<1x128xf32>
    %32 = arith.addf %31, %30 : vector<1x128xf32>
    %33 = arith.divf %31, %32 : vector<1x128xf32>
    %34 = arith.addf %21, %24 : vector<1x128xf32>
    %35 = arith.negf %34 : vector<1x128xf32>
    %36 = math.exp %35 : vector<1x128xf32>
    %cst_21 = arith.constant 1.000000e+00 : f32
    %37 = vector.broadcast %cst_21 : f32 to vector<1x128xf32>
    %38 = arith.addf %37, %36 : vector<1x128xf32>
    %39 = arith.divf %37, %38 : vector<1x128xf32>
    %40 = arith.mulf %33, %27 : vector<1x128xf32>
    %41 = arith.addf %22, %40 : vector<1x128xf32>
    %42 = math.tanh %41 : vector<1x128xf32>
    %cst_22 = arith.constant 1.000000e+00 : f32
    %43 = vector.broadcast %cst_22 : f32 to vector<1x128xf32>
    %44 = arith.subf %43, %39 : vector<1x128xf32>
    %45 = arith.mulf %44, %42 : vector<1x128xf32>
    %46 = arith.mulf %39, %9 : vector<1x128xf32>
    %47 = arith.addf %45, %46 : vector<1x128xf32>
    %48 = vector.extract_strided_slice %6 {offsets = [0, 384], sizes = [1, 384], strides = [1, 1]} : vector<1x768xf32> to vector<1x384xf32>
    %49 = vector.extract_strided_slice %48 {offsets = [0, 0], sizes = [1, 128], strides = [1, 1]} : vector<1x384xf32> to vector<1x128xf32>
    %50 = vector.extract_strided_slice %48 {offsets = [0, 128], sizes = [1, 128], strides = [1, 1]} : vector<1x384xf32> to vector<1x128xf32>
    %51 = vector.extract_strided_slice %48 {offsets = [0, 256], sizes = [1, 128], strides = [1, 1]} : vector<1x384xf32> to vector<1x128xf32>
    %52 = vector.extract_strided_slice %18 {offsets = [0, 0], sizes = [1, 128], strides = [1, 1]} : vector<1x384xf32> to vector<1x128xf32>
    %53 = vector.extract_strided_slice %18 {offsets = [0, 128], sizes = [1, 128], strides = [1, 1]} : vector<1x384xf32> to vector<1x128xf32>
    %54 = vector.extract_strided_slice %18 {offsets = [0, 256], sizes = [1, 128], strides = [1, 1]} : vector<1x384xf32> to vector<1x128xf32>
    %55 = vector.extract_strided_slice %8 {offsets = [0, 128], sizes = [1, 128], strides = [1, 1]} : vector<1x256xf32> to vector<1x128xf32>
    %56 = arith.addf %54, %55 : vector<1x128xf32>
    %57 = arith.addf %49, %52 : vector<1x128xf32>
    %58 = arith.negf %57 : vector<1x128xf32>
    %59 = math.exp %58 : vector<1x128xf32>
    %cst_23 = arith.constant 1.000000e+00 : f32
    %60 = vector.broadcast %cst_23 : f32 to vector<1x128xf32>
    %61 = arith.addf %60, %59 : vector<1x128xf32>
    %62 = arith.divf %60, %61 : vector<1x128xf32>
    %63 = arith.addf %50, %53 : vector<1x128xf32>
    %64 = arith.negf %63 : vector<1x128xf32>
    %65 = math.exp %64 : vector<1x128xf32>
    %cst_24 = arith.constant 1.000000e+00 : f32
    %66 = vector.broadcast %cst_24 : f32 to vector<1x128xf32>
    %67 = arith.addf %66, %65 : vector<1x128xf32>
    %68 = arith.divf %66, %67 : vector<1x128xf32>
    %69 = arith.mulf %62, %56 : vector<1x128xf32>
    %70 = arith.addf %51, %69 : vector<1x128xf32>
    %71 = math.tanh %70 : vector<1x128xf32>
    %cst_25 = arith.constant 1.000000e+00 : f32
    %72 = vector.broadcast %cst_25 : f32 to vector<1x128xf32>
    %73 = arith.subf %72, %68 : vector<1x128xf32>
    %74 = arith.mulf %73, %71 : vector<1x128xf32>
    %75 = arith.mulf %68, %10 : vector<1x128xf32>
    %76 = arith.addf %74, %75 : vector<1x128xf32>
    %77 = tpu.concatenate %47, %76 in 1 : vector<1x128xf32>, vector<1x128xf32> -> vector<1x256xf32>
    %78 = arith.truncf %77 : vector<1x256xf32> to vector<1x256xbf16>
    %c0_26 = arith.constant 0 : index
    %c0_27 = arith.constant 0 : index
    %c0_28 = arith.constant 0 : index
    %79 = vector.load %arg3[%c0_26, %c0_27, %c0_28] : memref<2x256x768xbf16, #tpu.memory_space<vmem>>, vector<1x256x768xbf16>
    %80 = vector.shape_cast %79 : vector<1x256x768xbf16> to vector<256x768xbf16>
    %cst_29 = arith.constant dense<0.000000e+00> : vector<1x768xf32>
    %81 = tpu.matmul %78, %80, %cst_29 {dimension_numbers = #tpu.dot_dimension_numbers<[1], [0], [0], [1], [0, 0, 1, 1], [], []>} : vector<1x256xbf16>, vector<256x768xbf16>, vector<1x768xf32> -> vector<1x768xf32>
    %c1_30 = arith.constant 1 : index
    %c0_31 = arith.constant 0 : index
    %c0_32 = arith.constant 0 : index
    %82 = vector.load %arg5[%c1_30, %c0_31, %c0_32] : memref<3x1x768xf32, #tpu.memory_space<vmem>>, vector<1x1x768xf32>
    %83 = vector.shape_cast %82 : vector<1x1x768xf32> to vector<1x768xf32>
    %84 = arith.addf %81, %83 : vector<1x768xf32>
    %c1_33 = arith.constant 1 : index
    %c0_34 = arith.constant 0 : index
    %c0_35 = arith.constant 0 : index
    %85 = vector.load %arg6[%c1_33, %c0_34, %c0_35] : memref<3x1x256xf32, #tpu.memory_space<vmem>>, vector<1x1x256xf32>
    %86 = vector.shape_cast %85 : vector<1x1x256xf32> to vector<1x256xf32>
    %c2 = arith.constant 2 : index
    %c0_36 = arith.constant 0 : index
    %87 = vector.load %arg1[%c2, %c0_36] : memref<6x128xf32, #tpu.memory_space<vmem>>, vector<1x128xf32>
    %c3 = arith.constant 3 : index
    %c0_37 = arith.constant 0 : index
    %88 = vector.load %arg1[%c3, %c0_37] : memref<6x128xf32, #tpu.memory_space<vmem>>, vector<1x128xf32>
    %89 = arith.truncf %87 : vector<1x128xf32> to vector<1x128xbf16>
    %c2_38 = arith.constant 2 : index
    %c0_39 = arith.constant 0 : index
    %c0_40 = arith.constant 0 : index
    %90 = vector.load %arg4[%c2_38, %c0_39, %c0_40] : memref<6x128x384xbf16, #tpu.memory_space<vmem>>, vector<1x128x384xbf16>
    %91 = vector.shape_cast %90 : vector<1x128x384xbf16> to vector<128x384xbf16>
    %cst_41 = arith.constant dense<0.000000e+00> : vector<1x384xf32>
    %92 = tpu.matmul %89, %91, %cst_41 {dimension_numbers = #tpu.dot_dimension_numbers<[1], [0], [0], [1], [0, 0, 1, 1], [], []>} : vector<1x128xbf16>, vector<128x384xbf16>, vector<1x384xf32> -> vector<1x384xf32>
    %93 = arith.truncf %88 : vector<1x128xf32> to vector<1x128xbf16>
    %c3_42 = arith.constant 3 : index
    %c0_43 = arith.constant 0 : index
    %c0_44 = arith.constant 0 : index
    %94 = vector.load %arg4[%c3_42, %c0_43, %c0_44] : memref<6x128x384xbf16, #tpu.memory_space<vmem>>, vector<1x128x384xbf16>
    %95 = vector.shape_cast %94 : vector<1x128x384xbf16> to vector<128x384xbf16>
    %cst_45 = arith.constant dense<0.000000e+00> : vector<1x384xf32>
    %96 = tpu.matmul %93, %95, %cst_45 {dimension_numbers = #tpu.dot_dimension_numbers<[1], [0], [0], [1], [0, 0, 1, 1], [], []>} : vector<1x128xbf16>, vector<128x384xbf16>, vector<1x384xf32> -> vector<1x384xf32>
    %97 = vector.extract_strided_slice %84 {offsets = [0, 0], sizes = [1, 384], strides = [1, 1]} : vector<1x768xf32> to vector<1x384xf32>
    %98 = vector.extract_strided_slice %97 {offsets = [0, 0], sizes = [1, 128], strides = [1, 1]} : vector<1x384xf32> to vector<1x128xf32>
    %99 = vector.extract_strided_slice %97 {offsets = [0, 128], sizes = [1, 128], strides = [1, 1]} : vector<1x384xf32> to vector<1x128xf32>
    %100 = vector.extract_strided_slice %97 {offsets = [0, 256], sizes = [1, 128], strides = [1, 1]} : vector<1x384xf32> to vector<1x128xf32>
    %101 = vector.extract_strided_slice %92 {offsets = [0, 0], sizes = [1, 128], strides = [1, 1]} : vector<1x384xf32> to vector<1x128xf32>
    %102 = vector.extract_strided_slice %92 {offsets = [0, 128], sizes = [1, 128], strides = [1, 1]} : vector<1x384xf32> to vector<1x128xf32>
    %103 = vector.extract_strided_slice %92 {offsets = [0, 256], sizes = [1, 128], strides = [1, 1]} : vector<1x384xf32> to vector<1x128xf32>
    %104 = vector.extract_strided_slice %86 {offsets = [0, 0], sizes = [1, 128], strides = [1, 1]} : vector<1x256xf32> to vector<1x128xf32>
    %105 = arith.addf %103, %104 : vector<1x128xf32>
    %106 = arith.addf %98, %101 : vector<1x128xf32>
    %107 = arith.negf %106 : vector<1x128xf32>
    %108 = math.exp %107 : vector<1x128xf32>
    %cst_46 = arith.constant 1.000000e+00 : f32
    %109 = vector.broadcast %cst_46 : f32 to vector<1x128xf32>
    %110 = arith.addf %109, %108 : vector<1x128xf32>
    %111 = arith.divf %109, %110 : vector<1x128xf32>
    %112 = arith.addf %99, %102 : vector<1x128xf32>
    %113 = arith.negf %112 : vector<1x128xf32>
    %114 = math.exp %113 : vector<1x128xf32>
    %cst_47 = arith.constant 1.000000e+00 : f32
    %115 = vector.broadcast %cst_47 : f32 to vector<1x128xf32>
    %116 = arith.addf %115, %114 : vector<1x128xf32>
    %117 = arith.divf %115, %116 : vector<1x128xf32>
    %118 = arith.mulf %111, %105 : vector<1x128xf32>
    %119 = arith.addf %100, %118 : vector<1x128xf32>
    %120 = math.tanh %119 : vector<1x128xf32>
    %cst_48 = arith.constant 1.000000e+00 : f32
    %121 = vector.broadcast %cst_48 : f32 to vector<1x128xf32>
    %122 = arith.subf %121, %117 : vector<1x128xf32>
    %123 = arith.mulf %122, %120 : vector<1x128xf32>
    %124 = arith.mulf %117, %87 : vector<1x128xf32>
    %125 = arith.addf %123, %124 : vector<1x128xf32>
    %126 = vector.extract_strided_slice %84 {offsets = [0, 384], sizes = [1, 384], strides = [1, 1]} : vector<1x768xf32> to vector<1x384xf32>
    %127 = vector.extract_strided_slice %126 {offsets = [0, 0], sizes = [1, 128], strides = [1, 1]} : vector<1x384xf32> to vector<1x128xf32>
    %128 = vector.extract_strided_slice %126 {offsets = [0, 128], sizes = [1, 128], strides = [1, 1]} : vector<1x384xf32> to vector<1x128xf32>
    %129 = vector.extract_strided_slice %126 {offsets = [0, 256], sizes = [1, 128], strides = [1, 1]} : vector<1x384xf32> to vector<1x128xf32>
    %130 = vector.extract_strided_slice %96 {offsets = [0, 0], sizes = [1, 128], strides = [1, 1]} : vector<1x384xf32> to vector<1x128xf32>
    %131 = vector.extract_strided_slice %96 {offsets = [0, 128], sizes = [1, 128], strides = [1, 1]} : vector<1x384xf32> to vector<1x128xf32>
    %132 = vector.extract_strided_slice %96 {offsets = [0, 256], sizes = [1, 128], strides = [1, 1]} : vector<1x384xf32> to vector<1x128xf32>
    %133 = vector.extract_strided_slice %86 {offsets = [0, 128], sizes = [1, 128], strides = [1, 1]} : vector<1x256xf32> to vector<1x128xf32>
    %134 = arith.addf %132, %133 : vector<1x128xf32>
    %135 = arith.addf %127, %130 : vector<1x128xf32>
    %136 = arith.negf %135 : vector<1x128xf32>
    %137 = math.exp %136 : vector<1x128xf32>
    %cst_49 = arith.constant 1.000000e+00 : f32
    %138 = vector.broadcast %cst_49 : f32 to vector<1x128xf32>
    %139 = arith.addf %138, %137 : vector<1x128xf32>
    %140 = arith.divf %138, %139 : vector<1x128xf32>
    %141 = arith.addf %128, %131 : vector<1x128xf32>
    %142 = arith.negf %141 : vector<1x128xf32>
    %143 = math.exp %142 : vector<1x128xf32>
    %cst_50 = arith.constant 1.000000e+00 : f32
    %144 = vector.broadcast %cst_50 : f32 to vector<1x128xf32>
    %145 = arith.addf %144, %143 : vector<1x128xf32>
    %146 = arith.divf %144, %145 : vector<1x128xf32>
    %147 = arith.mulf %140, %134 : vector<1x128xf32>
    %148 = arith.addf %129, %147 : vector<1x128xf32>
    %149 = math.tanh %148 : vector<1x128xf32>
    %cst_51 = arith.constant 1.000000e+00 : f32
    %150 = vector.broadcast %cst_51 : f32 to vector<1x128xf32>
    %151 = arith.subf %150, %146 : vector<1x128xf32>
    %152 = arith.mulf %151, %149 : vector<1x128xf32>
    %153 = arith.mulf %146, %88 : vector<1x128xf32>
    %154 = arith.addf %152, %153 : vector<1x128xf32>
    %155 = tpu.concatenate %125, %154 in 1 : vector<1x128xf32>, vector<1x128xf32> -> vector<1x256xf32>
    %156 = arith.truncf %155 : vector<1x256xf32> to vector<1x256xbf16>
    %c1_52 = arith.constant 1 : index
    %c0_53 = arith.constant 0 : index
    %c0_54 = arith.constant 0 : index
    %157 = vector.load %arg3[%c1_52, %c0_53, %c0_54] : memref<2x256x768xbf16, #tpu.memory_space<vmem>>, vector<1x256x768xbf16>
    %158 = vector.shape_cast %157 : vector<1x256x768xbf16> to vector<256x768xbf16>
    %cst_55 = arith.constant dense<0.000000e+00> : vector<1x768xf32>
    %159 = tpu.matmul %156, %158, %cst_55 {dimension_numbers = #tpu.dot_dimension_numbers<[1], [0], [0], [1], [0, 0, 1, 1], [], []>} : vector<1x256xbf16>, vector<256x768xbf16>, vector<1x768xf32> -> vector<1x768xf32>
    %c2_56 = arith.constant 2 : index
    %c0_57 = arith.constant 0 : index
    %c0_58 = arith.constant 0 : index
    %160 = vector.load %arg5[%c2_56, %c0_57, %c0_58] : memref<3x1x768xf32, #tpu.memory_space<vmem>>, vector<1x1x768xf32>
    %161 = vector.shape_cast %160 : vector<1x1x768xf32> to vector<1x768xf32>
    %162 = arith.addf %159, %161 : vector<1x768xf32>
    %c2_59 = arith.constant 2 : index
    %c0_60 = arith.constant 0 : index
    %c0_61 = arith.constant 0 : index
    %163 = vector.load %arg6[%c2_59, %c0_60, %c0_61] : memref<3x1x256xf32, #tpu.memory_space<vmem>>, vector<1x1x256xf32>
    %164 = vector.shape_cast %163 : vector<1x1x256xf32> to vector<1x256xf32>
    %c4 = arith.constant 4 : index
    %c0_62 = arith.constant 0 : index
    %165 = vector.load %arg1[%c4, %c0_62] : memref<6x128xf32, #tpu.memory_space<vmem>>, vector<1x128xf32>
    %c5 = arith.constant 5 : index
    %c0_63 = arith.constant 0 : index
    %166 = vector.load %arg1[%c5, %c0_63] : memref<6x128xf32, #tpu.memory_space<vmem>>, vector<1x128xf32>
    %167 = arith.truncf %165 : vector<1x128xf32> to vector<1x128xbf16>
    %c4_64 = arith.constant 4 : index
    %c0_65 = arith.constant 0 : index
    %c0_66 = arith.constant 0 : index
    %168 = vector.load %arg4[%c4_64, %c0_65, %c0_66] : memref<6x128x384xbf16, #tpu.memory_space<vmem>>, vector<1x128x384xbf16>
    %169 = vector.shape_cast %168 : vector<1x128x384xbf16> to vector<128x384xbf16>
    %cst_67 = arith.constant dense<0.000000e+00> : vector<1x384xf32>
    %170 = tpu.matmul %167, %169, %cst_67 {dimension_numbers = #tpu.dot_dimension_numbers<[1], [0], [0], [1], [0, 0, 1, 1], [], []>} : vector<1x128xbf16>, vector<128x384xbf16>, vector<1x384xf32> -> vector<1x384xf32>
    %171 = arith.truncf %166 : vector<1x128xf32> to vector<1x128xbf16>
    %c5_68 = arith.constant 5 : index
    %c0_69 = arith.constant 0 : index
    %c0_70 = arith.constant 0 : index
    %172 = vector.load %arg4[%c5_68, %c0_69, %c0_70] : memref<6x128x384xbf16, #tpu.memory_space<vmem>>, vector<1x128x384xbf16>
    %173 = vector.shape_cast %172 : vector<1x128x384xbf16> to vector<128x384xbf16>
    %cst_71 = arith.constant dense<0.000000e+00> : vector<1x384xf32>
    %174 = tpu.matmul %171, %173, %cst_71 {dimension_numbers = #tpu.dot_dimension_numbers<[1], [0], [0], [1], [0, 0, 1, 1], [], []>} : vector<1x128xbf16>, vector<128x384xbf16>, vector<1x384xf32> -> vector<1x384xf32>
    %175 = vector.extract_strided_slice %162 {offsets = [0, 0], sizes = [1, 384], strides = [1, 1]} : vector<1x768xf32> to vector<1x384xf32>
    %176 = vector.extract_strided_slice %175 {offsets = [0, 0], sizes = [1, 128], strides = [1, 1]} : vector<1x384xf32> to vector<1x128xf32>
    %177 = vector.extract_strided_slice %175 {offsets = [0, 128], sizes = [1, 128], strides = [1, 1]} : vector<1x384xf32> to vector<1x128xf32>
    %178 = vector.extract_strided_slice %175 {offsets = [0, 256], sizes = [1, 128], strides = [1, 1]} : vector<1x384xf32> to vector<1x128xf32>
    %179 = vector.extract_strided_slice %170 {offsets = [0, 0], sizes = [1, 128], strides = [1, 1]} : vector<1x384xf32> to vector<1x128xf32>
    %180 = vector.extract_strided_slice %170 {offsets = [0, 128], sizes = [1, 128], strides = [1, 1]} : vector<1x384xf32> to vector<1x128xf32>
    %181 = vector.extract_strided_slice %170 {offsets = [0, 256], sizes = [1, 128], strides = [1, 1]} : vector<1x384xf32> to vector<1x128xf32>
    %182 = vector.extract_strided_slice %164 {offsets = [0, 0], sizes = [1, 128], strides = [1, 1]} : vector<1x256xf32> to vector<1x128xf32>
    %183 = arith.addf %181, %182 : vector<1x128xf32>
    %184 = arith.addf %176, %179 : vector<1x128xf32>
    %185 = arith.negf %184 : vector<1x128xf32>
    %186 = math.exp %185 : vector<1x128xf32>
    %cst_72 = arith.constant 1.000000e+00 : f32
    %187 = vector.broadcast %cst_72 : f32 to vector<1x128xf32>
    %188 = arith.addf %187, %186 : vector<1x128xf32>
    %189 = arith.divf %187, %188 : vector<1x128xf32>
    %190 = arith.addf %177, %180 : vector<1x128xf32>
    %191 = arith.negf %190 : vector<1x128xf32>
    %192 = math.exp %191 : vector<1x128xf32>
    %cst_73 = arith.constant 1.000000e+00 : f32
    %193 = vector.broadcast %cst_73 : f32 to vector<1x128xf32>
    %194 = arith.addf %193, %192 : vector<1x128xf32>
    %195 = arith.divf %193, %194 : vector<1x128xf32>
    %196 = arith.mulf %189, %183 : vector<1x128xf32>
    %197 = arith.addf %178, %196 : vector<1x128xf32>
    %198 = math.tanh %197 : vector<1x128xf32>
    %cst_74 = arith.constant 1.000000e+00 : f32
    %199 = vector.broadcast %cst_74 : f32 to vector<1x128xf32>
    %200 = arith.subf %199, %195 : vector<1x128xf32>
    %201 = arith.mulf %200, %198 : vector<1x128xf32>
    %202 = arith.mulf %195, %165 : vector<1x128xf32>
    %203 = arith.addf %201, %202 : vector<1x128xf32>
    %204 = vector.extract_strided_slice %162 {offsets = [0, 384], sizes = [1, 384], strides = [1, 1]} : vector<1x768xf32> to vector<1x384xf32>
    %205 = vector.extract_strided_slice %204 {offsets = [0, 0], sizes = [1, 128], strides = [1, 1]} : vector<1x384xf32> to vector<1x128xf32>
    %206 = vector.extract_strided_slice %204 {offsets = [0, 128], sizes = [1, 128], strides = [1, 1]} : vector<1x384xf32> to vector<1x128xf32>
    %207 = vector.extract_strided_slice %204 {offsets = [0, 256], sizes = [1, 128], strides = [1, 1]} : vector<1x384xf32> to vector<1x128xf32>
    %208 = vector.extract_strided_slice %174 {offsets = [0, 0], sizes = [1, 128], strides = [1, 1]} : vector<1x384xf32> to vector<1x128xf32>
    %209 = vector.extract_strided_slice %174 {offsets = [0, 128], sizes = [1, 128], strides = [1, 1]} : vector<1x384xf32> to vector<1x128xf32>
    %210 = vector.extract_strided_slice %174 {offsets = [0, 256], sizes = [1, 128], strides = [1, 1]} : vector<1x384xf32> to vector<1x128xf32>
    %211 = vector.extract_strided_slice %164 {offsets = [0, 128], sizes = [1, 128], strides = [1, 1]} : vector<1x256xf32> to vector<1x128xf32>
    %212 = arith.addf %210, %211 : vector<1x128xf32>
    %213 = arith.addf %205, %208 : vector<1x128xf32>
    %214 = arith.negf %213 : vector<1x128xf32>
    %215 = math.exp %214 : vector<1x128xf32>
    %cst_75 = arith.constant 1.000000e+00 : f32
    %216 = vector.broadcast %cst_75 : f32 to vector<1x128xf32>
    %217 = arith.addf %216, %215 : vector<1x128xf32>
    %218 = arith.divf %216, %217 : vector<1x128xf32>
    %219 = arith.addf %206, %209 : vector<1x128xf32>
    %220 = arith.negf %219 : vector<1x128xf32>
    %221 = math.exp %220 : vector<1x128xf32>
    %cst_76 = arith.constant 1.000000e+00 : f32
    %222 = vector.broadcast %cst_76 : f32 to vector<1x128xf32>
    %223 = arith.addf %222, %221 : vector<1x128xf32>
    %224 = arith.divf %222, %223 : vector<1x128xf32>
    %225 = arith.mulf %218, %212 : vector<1x128xf32>
    %226 = arith.addf %207, %225 : vector<1x128xf32>
    %227 = math.tanh %226 : vector<1x128xf32>
    %cst_77 = arith.constant 1.000000e+00 : f32
    %228 = vector.broadcast %cst_77 : f32 to vector<1x128xf32>
    %229 = arith.subf %228, %224 : vector<1x128xf32>
    %230 = arith.mulf %229, %227 : vector<1x128xf32>
    %231 = arith.mulf %224, %166 : vector<1x128xf32>
    %232 = arith.addf %230, %231 : vector<1x128xf32>
    %233 = tpu.concatenate %203, %232 in 1 : vector<1x128xf32>, vector<1x128xf32> -> vector<1x256xf32>
    %c0_78 = arith.constant 0 : index
    %c0_79 = arith.constant 0 : index
    %234 = vector.load %arg7[%c0_78, %c0_79] : memref<1x256xf32, #tpu.memory_space<vmem>>, vector<1x256xf32>
    tpu.vector_store %arg7[%c0_78, %c0_79], %233 {strides = array<i32>} : memref<1x256xf32, #tpu.memory_space<vmem>>, vector<1x256xf32>,
    %235 = tpu.concatenate %47, %76, %125, %154, %203, %232 in 0 : vector<1x128xf32>, vector<1x128xf32>, vector<1x128xf32>, vector<1x128xf32>, vector<1x128xf32>, vector<1x128xf32> -> vector<6x128xf32>
    %c0_80 = arith.constant 0 : index
    %c0_81 = arith.constant 0 : index
    %236 = vector.load %arg8[%c0_80, %c0_81] : memref<6x128xf32, #tpu.memory_space<vmem>>, vector<6x128xf32>
    tpu.vector_store %arg8[%c0_80, %c0_81], %235 {strides = array<i32>} : memref<6x128xf32, #tpu.memory_space<vmem>>, vector<6x128xf32>,
    return
  }
}

</mosaic_0001>

<bundles_post_ra>
// kernel: encoder_rnn_forward.1
= control target key start
LH: loop header
LB: loop body
LE: loop exit
PB: predicated region body
PF: predicated region fallthrough
CT: control target
= control target key end

     0   :  { %14 = vsyncpa [#allocation3], 0  ;;  %s5339_s0 = inlined_call_operand.vmem [shape: f32[1,128], index: 0, kind: input, shape index: {}]   ;;  %s5340_s1 = inlined_call_operand.vmem [shape: f32[6,128], index: 1, kind: input, shape index: {}, may-alias: {1,8}]   ;;  %s5341_s2 = inlined_call_operand.hbm [shape: bf16[128,768], index: 2, kind: input, shape index: {}]   ;;  %s5342_s3 = inlined_call_operand.hbm [shape: bf16[2,256,768], index: 3, kind: input, shape index: {}]   ;;  %s5343_s4 = inlined_call_operand.hbm [shape: bf16[6,128,384], index: 4, kind: input, shape index: {}]   ;;  %s5344_s5 = inlined_call_operand.vmem [shape: f32[3,1,768], index: 5, kind: input, shape index: {}]   ;;  %s5345_s6 = inlined_call_operand.vmem [shape: f32[3,1,256], index: 6, kind: input, shape index: {}]   ;;  %s5346_s7 = inlined_call_operand.hbm [shape: f32[1,256], index: 7, kind: output, shape index: {0}]   ;;  %s5347_s8 = inlined_call_operand.vmem [shape: f32[6,128], index: 8, kind: output, shape index: {1}, may-alias: {1,8}]  }
   0x1   :  { %15 = vsyncpa [#allocation6], 0 }
   0x2   :  { %16 = vsyncpa [#allocation4], 0  ;;  %s4982_s27 = smov [#allocation5]   ;;  %s4983_s29 = smov [#allocation2]  }
   0x3   :  { %s38_s28 = sshll.u32 %s4982_s27, 4  ;;  %s26_s30 = sshll.u32 %s4983_s29, 4  ;;  %s39_s28 = int_to_ptr.vmem [resolvable:$true] %s38_s28  ;;  %s5039_s30 = int_to_ptr.vmem [resolvable:$true] %s26_s30 }
   0x4   :  { %s4888_s11 = scalar_lea.hbm %s5342_s3, 24576 }
   0x5   :  { %p4889_p0 = scmp.ne.s32.totalorder %s5342_s3, %s4888_s11  ;;  %p4892_p1 = scmp.lt.u32.totalorder %s4888_s11, %s5342_s3 }
   0x7   :  { %p4894_p2 = pnand %p4892_p1, %p4889_p0 }
   0x9   :  { %4897 = shalt.err (!%p4894_p2)
}
   0xa   :  { %s4898_s16 = scalar_lea.vmem %s39_s28, 24576  ;;  %p4903_p4 = scmp.lt.s32.totalorder %s39_s28, %s39_s28 }
   0xb   :  { %p4899_p3 = scmp.ne.s32.totalorder %s39_s28, %s4898_s16  ;;  %p4904_p5 = scmp.lt.s32.totalorder %s4898_s16, %s4898_s16 }
   0xd   :  { %p4905_p6 = por %p4904_p5, %p4903_p4 }
   0xf   :  { %p4906_p7 = pnand %p4905_p6, %p4899_p3 }
  0x11   :  { %4909 = shalt.err (!%p4906_p7)
}
  0x12   :  { %s4984_s17 = smov 384   ;;  %s4985_s18 = smov 24  }
  0x13   :  { %44 = dma.hbm_to_vmem [thread:$0]  %s5342_s3, 24576, %s39_s28, [#allocation6], %s4984_s17, %s4984_s17, %s4985_s18  }
  0x14   :  { %s4910_s23 = scalar_lea.hbm %s5341_s2, 6144 }
  0x15   :  { %p4911_p8 = scmp.ne.s32.totalorder %s5341_s2, %s4910_s23  ;;  %p4914_p9 = scmp.lt.u32.totalorder %s4910_s23, %s5341_s2 }
  0x17   :  { %p4916_p10 = pnand %p4914_p9, %p4911_p8 }
  0x19   :  { %4919 = shalt.err (!%p4916_p10)
}
  0x1a   :  { %s4920_s29 = scalar_lea.vmem %s5039_s30, 6144  ;;  %p4925_p12 = scmp.lt.s32.totalorder %s5039_s30, %s5039_s30 }
  0x1b   :  { %p4921_p11 = scmp.ne.s32.totalorder %s5039_s30, %s4920_s29  ;;  %p4926_p13 = scmp.lt.s32.totalorder %s4920_s29, %s4920_s29 }
  0x1d   :  { %p4927_p0 = por %p4926_p13, %p4925_p12 }
  0x1f   :  { %p4928_p1 = pnand %p4927_p0, %p4921_p11 }
  0x21   :  { %4931 = shalt.err (!%p4928_p1)
}
  0x22   :  { %32 = dma.hbm_to_vmem [thread:$0]  %s5341_s2, 6144, %s5039_s30, [#allocation3], %s4984_s17, %s4984_s17, %s4985_s18  }
  0x23   :  { %s4986_s9 = smov [#allocation7]   ;;  %s4932_s13 = scalar_lea.hbm %s5343_s4, 18432 }
  0x24   :  { %s50_s10 = sshll.u32 %s4986_s9, 4  ;;  %p4933_p2 = scmp.ne.s32.totalorder %s5343_s4, %s4932_s13  ;;  %s51_s10 = int_to_ptr.vmem [resolvable:$true] %s50_s10 }
  0x25   :  { %p4936_p3 = scmp.lt.u32.totalorder %s4932_s13, %s5343_s4 }
  0x27   :  { %p4938_p4 = pnand %p4936_p3, %p4933_p2 }
  0x29   :  { %4941 = shalt.err (!%p4938_p4)
}
  0x2a   :  { %s4942_s20 = scalar_lea.vmem %s51_s10, 18432  ;;  %p4947_p6 = scmp.lt.s32.totalorder %s51_s10, %s51_s10 }
  0x2b   :  { %p4943_p5 = scmp.ne.s32.totalorder %s51_s10, %s4942_s20  ;;  %p4948_p7 = scmp.lt.s32.totalorder %s4942_s20, %s4942_s20 }
  0x2d   :  { %p4949_p8 = por %p4948_p7, %p4947_p6 }
  0x2f   :  { %p4950_p9 = pnand %p4949_p8, %p4943_p5 }
  0x31   :  { %4953 = shalt.err (!%p4950_p9)
}
  0x32   :  { %s4987_s2 = smov 192   ;;  %s4988_s30 = smov 12  }
  0x33   :  { %56 = dma.hbm_to_vmem [thread:$0]  %s5343_s4, 18432, %s51_s10, [#allocation6], %s4987_s2, %s4987_s2, %s4988_s30  }
  0x34   :  { %4976 = dma.done.wait [#allocation3], 6144  }
  0x35   :  { %4977 = vsyncadd [#allocation3], 4294961152 }
  0x36   :  { %4978 = dma.done.wait [#allocation6], 43008  }
  0x37   :  { %4979 = vsyncadd [#allocation6], 4294924288  ;;  %v4989_v0 = vmov 0   ;;  %v4274_v1 = vld [vmem:[#allocation2 + $0x4] ss:$24 sps:$4 sm:$0xff]   ;;  %v4990_v38 = vmov 0.0  }
  0x38   :  { %425 = vmatprep.mubr.bf16.mxu0 %v4989_v0  ;;  %466 = vmatprep.mubr.bf16.mxu1 %v4989_v0  ;;  %v4276_v2 = vld [vmem:[#allocation2 + $0xc] ss:$24 sps:$4 sm:$0xff]   ;;  %v4278_v3 = vld [vmem:[#allocation2] ss:$24 sps:$4 sm:$0xff]   ;;  %v4282_v6 = vld [vmem:[#allocation2 + $0x3c] ss:$24 sps:$4 sm:$0xff]  }
  0x39   :  { %393 = vmatprep.subr.bf16.mxu0 %v4274_v1  ;;  %v4279_v4 = vld [vmem:[#allocation2 + $0x8] ss:$24 sps:$4 sm:$0xff]   ;;  %434 = vmatprep.subr.bf16.mxu1 %v4276_v2  ;;  %v4280_v5 = vld [vmem:[#allocation2 + $0x34] ss:$24 sps:$4 sm:$0xff]   ;;  %v4285_v8 = vld [vmem:[#allocation2 + $0x38] ss:$24 sps:$4 sm:$0xff]  }
  0x3a   :  { %394 = vmatpush1.bf16.msra.mxu0 %v4278_v3  ;;  %435 = vmatpush1.bf16.msra.mxu1 %v4279_v4  ;;  %v4284_v7 = vld [vmem:[#allocation2 + $0x30] ss:$24 sps:$4 sm:$0xff]   ;;  %v4286_v9 = vld [vmem:[#allocation2 + $0x64] ss:$24 sps:$4 sm:$0xff]   ;;  %v4290_v11 = vld [vmem:[#allocation2 + $0x60] ss:$24 sps:$4 sm:$0xff]  }
  0x3b   :  { %395 = vmatprep.subr.bf16.mxu0 %v4280_v5  ;;  %436 = vmatprep.subr.bf16.mxu1 %v4282_v6  ;;  %v4288_v10 = vld [vmem:[#allocation2 + $0x6c] ss:$24 sps:$4 sm:$0xff]   ;;  %v4291_v12 = vld [vmem:[#allocation2 + $0x68] ss:$24 sps:$4 sm:$0xff]   ;;  %v4294_v14 = vld [vmem:[#allocation2 + $0x9c] ss:$24 sps:$4 sm:$0xff]  }
  0x3c   :  { %v4292_v13 = vld [vmem:[#allocation2 + $0x94] ss:$24 sps:$4 sm:$0xff]   ;;  %v4296_v15 = vld [vmem:[#allocation2 + $0x90] ss:$24 sps:$4 sm:$0xff]   ;;  %v4298_v17 = vld [vmem:[#allocation2 + $0xc4] ss:$24 sps:$4 sm:$0xff]  }
  0x3d   :  { %v4297_v16 = vld [vmem:[#allocation2 + $0x98] ss:$24 sps:$4 sm:$0xff]   ;;  %v4300_v18 = vld [vmem:[#allocation2 + $0xcc] ss:$24 sps:$4 sm:$0xff]   ;;  %v4303_v20 = vld [vmem:[#allocation2 + $0xc8] ss:$24 sps:$4 sm:$0xff]  }
  0x3e   :  { %396 = vmatpush1.bf16.msra.mxu0 %v4284_v7  ;;  %437 = vmatpush1.bf16.msra.mxu1 %v4285_v8  ;;  %v4302_v19 = vld [vmem:[#allocation2 + $0xc0] ss:$24 sps:$4 sm:$0xff]   ;;  %v4304_v21 = vld [vmem:[#allocation2 + $0xf4] ss:$24 sps:$4 sm:$0xff]   ;;  %v4308_v23 = vld [vmem:[#allocation2 + $0xf0] ss:$24 sps:$4 sm:$0xff]  }
  0x3f   :  { %397 = vmatprep.subr.bf16.mxu0 %v4286_v9  ;;  %438 = vmatprep.subr.bf16.mxu1 %v4288_v10  ;;  %v4306_v22 = vld [vmem:[#allocation2 + $0xfc] ss:$24 sps:$4 sm:$0xff]   ;;  %v4309_v24 = vld [vmem:[#allocation2 + $0xf8] ss:$24 sps:$4 sm:$0xff]   ;;  %v4312_v26 = vld [vmem:[#allocation2 + $0x12c] ss:$24 sps:$4 sm:$0xff]  }
  0x40   :  { %v4310_v25 = vld [vmem:[#allocation2 + $0x124] ss:$24 sps:$4 sm:$0xff]   ;;  %v4314_v27 = vld [vmem:[#allocation2 + $0x120] ss:$24 sps:$4 sm:$0xff]   ;;  %v4316_v29 = vld [vmem:[#allocation2 + $0x154] ss:$24 sps:$4 sm:$0xff]  }
  0x41   :  { %v4315_v28 = vld [vmem:[#allocation2 + $0x128] ss:$24 sps:$4 sm:$0xff]   ;;  %v4318_v30 = vld [vmem:[#allocation2 + $0x15c] ss:$24 sps:$4 sm:$0xff]   ;;  %v4321_v32 = vld [vmem:[#allocation2 + $0x158] ss:$24 sps:$4 sm:$0xff]  }
  0x42   :  { %398 = vmatpush1.bf16.msra.mxu0 %v4290_v11  ;;  %439 = vmatpush1.bf16.msra.mxu1 %v4291_v12  ;;  %v4320_v31 = vld [vmem:[#allocation2 + $0x150] ss:$24 sps:$4 sm:$0xff]   ;;  %v71_v33 = vld [vmem:[%s5339_s0] sm:$0x1]  ;;  %v4324_v34 = vld [vmem:[#allocation2 + $0x14] ss:$24 sps:$4 sm:$0xff]  }
  0x43   :  { %399 = vmatprep.subr.bf16.mxu0 %v4292_v13  ;;  %440 = vmatprep.subr.bf16.mxu1 %v4294_v14  ;;  %v4322_v35 = vld [vmem:[#allocation2 + $0x10] ss:$24 sps:$4 sm:$0xff]   ;;  %v5087_v36 = vpack.c.bf16 %v71_v33, %v71_v33  ;;  %v4328_v39 = vld [vmem:[#allocation2 + $0x44] ss:$24 sps:$4 sm:$0xff]   ;;  %v4326_v40 = vld [vmem:[#allocation2 + $0x40] ss:$24 sps:$4 sm:$0xff]  }
  0x44   :  { %v4325_v37 = vld [vmem:[#allocation7 + $0x8] ss:$12 sps:$4 sm:$0xff]   ;;  %v4329_v41 = vld [vmem:[#allocation7 + $0x20] ss:$12 sps:$4 sm:$0xff]   ;;  %vm4991_vm0 = vmmov 0   ;;  %vm3639_vm1 = vcmask 1040384  }
  0x45   :  { %v4332_v42 = vld [vmem:[#allocation2 + $0x74] ss:$24 sps:$4 sm:$0xff]   ;;  %v4330_v43 = vld [vmem:[#allocation2 + $0x70] ss:$24 sps:$4 sm:$0xff]   ;;  %v4333_v44 = vld [vmem:[#allocation7 + $0x38] ss:$12 sps:$4 sm:$0xff]  }
  0x46   :  { %400 = vmatpush1.bf16.msra.mxu0 %v4296_v15  ;;  %441 = vmatpush1.bf16.msra.mxu1 %v4297_v16  ;;  %v4336_v45 = vld [vmem:[#allocation2 + $0xa4] ss:$24 sps:$4 sm:$0xff]   ;;  %v4334_v46 = vld [vmem:[#allocation2 + $0xa0] ss:$24 sps:$4 sm:$0xff]   ;;  %v4340_v48 = vld [vmem:[#allocation2 + $0xd4] ss:$24 sps:$4 sm:$0xff]  }
  0x47   :  { %401 = vmatprep.subr.bf16.mxu0 %v4298_v17  ;;  %442 = vmatprep.subr.bf16.mxu1 %v4300_v18  ;;  %v4337_v47 = vld [vmem:[#allocation7 + $0x50] ss:$12 sps:$4 sm:$0xff]   ;;  %v4341_v50 = vld [vmem:[#allocation7 + $0x68] ss:$12 sps:$4 sm:$0xff]   ;;  %v4342_v52 = vld [vmem:[#allocation2 + $0x100] ss:$24 sps:$4 sm:$0xff]  }
  0x48   :  { %v4338_v49 = vld [vmem:[#allocation2 + $0xd0] ss:$24 sps:$4 sm:$0xff]   ;;  %v4344_v51 = vld [vmem:[#allocation2 + $0x104] ss:$24 sps:$4 sm:$0xff]   ;;  %v4345_v53 = vld [vmem:[#allocation7 + $0x80] ss:$12 sps:$4 sm:$0xff]  }
  0x49   :  { %v4348_v54 = vld [vmem:[#allocation2 + $0x134] ss:$24 sps:$4 sm:$0xff]   ;;  %v4346_v55 = vld [vmem:[#allocation2 + $0x130] ss:$24 sps:$4 sm:$0xff]   ;;  %v4349_v56 = vld [vmem:[#allocation7 + $0x98] ss:$12 sps:$4 sm:$0xff]  }
  0x4a   :  { %402 = vmatpush1.bf16.msra.mxu0 %v4302_v19  ;;  %443 = vmatpush1.bf16.msra.mxu1 %v4303_v20  ;;  %v4352_v57 = vld [vmem:[#allocation2 + $0x164] ss:$24 sps:$4 sm:$0xff]   ;;  %v4350_v58 = vld [vmem:[#allocation2 + $0x160] ss:$24 sps:$4 sm:$0xff]   ;;  %v4372_v13 = vld [vmem:[#allocation7 + $0x48] ss:$12 sps:$4 sm:$0xff]  }
  0x4b   :  { %403 = vmatprep.subr.bf16.mxu0 %v4304_v21  ;;  %444 = vmatprep.subr.bf16.mxu1 %v4306_v22  ;;  %v4353_v59 = vld [vmem:[#allocation7 + $0xb0] ss:$12 sps:$4 sm:$0xff]   ;;  %v517_v60 = vld [vmem:[%s5340_s1] sm:$0x1]  ;;  %v4360_v5 = vld [vmem:[#allocation7 + $0x18] ss:$12 sps:$4 sm:$0xff]  }
  0x4c   :  { %v4356_v61 = vld [vmem:[#allocation7 + $0x4] ss:$12 sps:$4 sm:$0xff]   ;;  %v4354_v63 = vld [vmem:[#allocation7] ss:$12 sps:$4 sm:$0xff]   ;;  %v5105_v2 = vpack.c.bf16 %v517_v60, %v517_v60  ;;  %v4362_v3 = vld [vmem:[#allocation7 + $0x1c] ss:$12 sps:$4 sm:$0xff]  }
  0x4d   :  { %v4359_v62 = vld [vmem:[#allocation7 + $0xc4] ss:$12 sps:$4 sm:$0xff]   ;;  %v4357_v1 = vld [vmem:[#allocation7 + $0xc0] ss:$12 sps:$4 sm:$0xff]   ;;  %v4365_v4 = vld [vmem:[#allocation7 + $0xdc] ss:$12 sps:$4 sm:$0xff]  }
  0x4e   :  { %404 = vmatpush1.bf16.msra.mxu0 %v4308_v23  ;;  %445 = vmatpush1.bf16.msra.mxu1 %v4309_v24  ;;  %v4363_v6 = vld [vmem:[#allocation7 + $0xd8] ss:$12 sps:$4 sm:$0xff]   ;;  %v4368_v7 = vld [vmem:[#allocation7 + $0x34] ss:$12 sps:$4 sm:$0xff]   ;;  %v4366_v9 = vld [vmem:[#allocation7 + $0x30] ss:$12 sps:$4 sm:$0xff]  }
  0x4f   :  { %405 = vmatprep.subr.bf16.mxu0 %v4310_v25  ;;  %446 = vmatprep.subr.bf16.mxu1 %v4312_v26  ;;  %v4371_v8 = vld [vmem:[#allocation7 + $0xf4] ss:$12 sps:$4 sm:$0xff]   ;;  %v4369_v10 = vld [vmem:[#allocation7 + $0xf0] ss:$12 sps:$4 sm:$0xff]   ;;  %v4374_v11 = vld [vmem:[#allocation7 + $0x4c] ss:$12 sps:$4 sm:$0xff]  }
  0x50   :  { %v4377_v12 = vld [vmem:[#allocation7 + $0x10c] ss:$12 sps:$4 sm:$0xff]   ;;  %v4375_v14 = vld [vmem:[#allocation7 + $0x108] ss:$12 sps:$4 sm:$0xff]   ;;  %v4380_v15 = vld [vmem:[#allocation7 + $0x64] ss:$12 sps:$4 sm:$0xff]  }
  0x51   :  { %v4383_v16 = vld [vmem:[#allocation7 + $0x124] ss:$12 sps:$4 sm:$0xff]   ;;  %v4378_v17 = vld [vmem:[#allocation7 + $0x60] ss:$12 sps:$4 sm:$0xff]   ;;  %v4386_v19 = vld [vmem:[#allocation7 + $0x7c] ss:$12 sps:$4 sm:$0xff]  }
  0x52   :  { %406 = vmatpush1.bf16.msra.mxu0 %v4314_v27  ;;  %447 = vmatpush1.bf16.msra.mxu1 %v4315_v28  ;;  %v4381_v18 = vld [vmem:[#allocation7 + $0x120] ss:$12 sps:$4 sm:$0xff]   ;;  %v4389_v20 = vld [vmem:[#allocation7 + $0x13c] ss:$12 sps:$4 sm:$0xff]   ;;  %v4384_v21 = vld [vmem:[#allocation7 + $0x78] ss:$12 sps:$4 sm:$0xff]  }
  0x53   :  { %407 = vmatprep.subr.bf16.mxu0 %v4316_v29  ;;  %448 = vmatprep.subr.bf16.mxu1 %v4318_v30  ;;  %v4387_v22 = vld [vmem:[#allocation7 + $0x138] ss:$12 sps:$4 sm:$0xff]   ;;  %v4392_v23 = vld [vmem:[#allocation7 + $0x94] ss:$12 sps:$4 sm:$0xff]   ;;  %v4390_v25 = vld [vmem:[#allocation7 + $0x90] ss:$12 sps:$4 sm:$0xff]  }
  0x54   :  { %v4395_v24 = vld [vmem:[#allocation7 + $0x154] ss:$12 sps:$4 sm:$0xff]   ;;  %v4393_v26 = vld [vmem:[#allocation7 + $0x150] ss:$12 sps:$4 sm:$0xff]   ;;  %v4398_v27 = vld [vmem:[#allocation7 + $0xac] ss:$12 sps:$4 sm:$0xff]  }
  0x55   :  { %v4401_v28 = vld [vmem:[#allocation7 + $0x16c] ss:$12 sps:$4 sm:$0xff]   ;;  %v4396_v29 = vld [vmem:[#allocation7 + $0xa8] ss:$12 sps:$4 sm:$0xff]   ;;  %vm3641_vm2 = vcmask 1041408   ;;  %vm3643_vm3 = vcmask 1042432  }
  0x56   :  { %408 = vmatpush1.bf16.msra.mxu0 %v4320_v31  ;;  %449 = vmatpush1.bf16.msra.mxu1 %v4321_v32  ;;  %v4399_v30 = vld [vmem:[#allocation7 + $0x168] ss:$12 sps:$4 sm:$0xff]   ;;  %v518_v31 = vld [vmem:[%s5340_s1 + $0x1] sm:$0x1]  ;;  %vm3645_vm4 = vcmask 1043456   ;;  %vm3647_vm5 = vcmask 1044480  }
  0x57   :  { %475 = vmatprep.subr.bf16.mxu0 %v4324_v34  ;;  %4124 = vmatprep.subr.bf16.mxu1 %v4990_v38  ;;  %v4402_v32 = vld [vmem:[#allocation7 + $0xc8] ss:$12 sps:$4 sm:$0xff]   ;;  %v761_v33 = vpack.c.bf16 %v518_v31, %v518_v31  ;;  %v4403_v34 = vld [vmem:[#allocation7 + $0xe0] ss:$12 sps:$4 sm:$0xff]  }
  0x58   :  { %v4434_v60 = vld [vmem:[#allocation5 + $0xc0] ss:$24 sps:$4 sm:$0xff]   ;;  %v4490_v31 = vld [vmem:[#allocation5 + $0x274] ss:$24 sps:$4 sm:$0xff]  }
  0x59   :  { %426 = vmatmul.mubr.bf16.vlgmr.msra.gmra.mrb[0].mxu0 %v5087_v36  ;;  %467 = vmatmul.mubr.bf16.vlgmr.msra.gmra.mrb[0].mxu1 %v5087_v36 }
  0x5a   :  { %476 = vmatpush1.bf16.msra.mxu0 %v4322_v35  ;;  %4125 = vmatpush3.bf16.msra.mxu1 %v4325_v37  ;;  %v4404_v35 = vld [vmem:[#allocation7 + $0xf8] ss:$12 sps:$4 sm:$0xff]   ;;  %v4406_v37 = vld [vmem:[#allocation7 + $0x128] ss:$12 sps:$4 sm:$0xff]  }
  0x5b   :  { %477 = vmatprep.subr.bf16.mxu0 %v4328_v39  ;;  %4126 = vmatprep.subr.bf16.mxu1 %v4990_v38  ;;  %v4407_v39 = vld [vmem:[#allocation7 + $0x140] ss:$12 sps:$4 sm:$0xff]  }
  0x5c   :  { %507 = vmatprep.mubr.bf16.mxu0 %v4989_v0  ;;  %4140 = vmatprep.mubr.msk.bf16.mxu1 %vm4991_vm0, %v4990_v38 }
  0x5e   :  { %478 = vmatpush1.bf16.msra.mxu0 %v4326_v40  ;;  %4127 = vmatpush3.bf16.msra.mxu1 %v4329_v41  ;;  %v4408_v40 = vld [vmem:[#allocation7 + $0x158] ss:$12 sps:$4 sm:$0xff]   ;;  %v4409_v41 = vld [vmem:[#allocation7 + $0x170] ss:$12 sps:$4 sm:$0xff]  }
  0x5f   :  { %479 = vmatprep.subr.bf16.mxu0 %v4332_v42  ;;  %4128 = vmatprep.subr.bf16.mxu1 %v4990_v38  ;;  %v4410_v42 = vld [vmem:[#allocation5] ss:$24 sps:$4 sm:$0xff]  }
  0x62   :  { %480 = vmatpush1.bf16.msra.mxu0 %v4330_v43  ;;  %4129 = vmatpush3.bf16.msra.mxu1 %v4333_v44  ;;  %v4412_v43 = vld [vmem:[#allocation5 + $0x4] ss:$24 sps:$4 sm:$0xff]   ;;  %v4413_v44 = vld [vmem:[#allocation5 + $0x8] ss:$24 sps:$4 sm:$0xff]  }
  0x63   :  { %481 = vmatprep.subr.bf16.mxu0 %v4336_v45  ;;  %4130 = vmatprep.subr.bf16.mxu1 %v4990_v38  ;;  %v4415_v45 = vld [vmem:[#allocation5 + $0xc] ss:$24 sps:$4 sm:$0xff]  }
  0x66   :  { %482 = vmatpush1.bf16.msra.mxu0 %v4334_v46  ;;  %4131 = vmatpush3.bf16.msra.mxu1 %v4337_v47  ;;  %v4416_v46 = vld [vmem:[#allocation5 + $0x30] ss:$24 sps:$4 sm:$0xff]   ;;  %v4418_v47 = vld [vmem:[#allocation5 + $0x34] ss:$24 sps:$4 sm:$0xff]  }
  0x67   :  { %483 = vmatprep.subr.bf16.mxu0 %v4340_v48  ;;  %4132 = vmatprep.subr.bf16.mxu1 %v4990_v38  ;;  %v4419_v48 = vld [vmem:[#allocation5 + $0x38] ss:$24 sps:$4 sm:$0xff]  }
  0x6a   :  { %484 = vmatpush1.bf16.msra.mxu0 %v4338_v49  ;;  %4133 = vmatpush3.bf16.msra.mxu1 %v4341_v50  ;;  %v4421_v49 = vld [vmem:[#allocation5 + $0x3c] ss:$24 sps:$4 sm:$0xff]  }
  0x6b   :  { %485 = vmatprep.subr.bf16.mxu0 %v4344_v51  ;;  %4134 = vmatprep.subr.bf16.mxu1 %v4990_v38  ;;  %v4424_v50 = vld [vmem:[#allocation5 + $0x64] ss:$24 sps:$4 sm:$0xff]  }
  0x6c   :  { %v4427_v51 = vld [vmem:[#allocation5 + $0x6c] ss:$24 sps:$4 sm:$0xff]  }
  0x6e   :  { %486 = vmatpush1.bf16.msra.mxu0 %v4342_v52  ;;  %4135 = vmatpush3.bf16.msra.mxu1 %v4345_v53  ;;  %v4422_v52 = vld [vmem:[#allocation5 + $0x60] ss:$24 sps:$4 sm:$0xff]  }
  0x6f   :  { %487 = vmatprep.subr.bf16.mxu0 %v4348_v54  ;;  %4136 = vmatprep.subr.bf16.mxu1 %v4990_v38  ;;  %v4425_v53 = vld [vmem:[#allocation5 + $0x68] ss:$24 sps:$4 sm:$0xff]   ;;  %v4430_v54 = vld [vmem:[#allocation5 + $0x94] ss:$24 sps:$4 sm:$0xff]  }
  0x72   :  { %488 = vmatpush1.bf16.msra.mxu0 %v4346_v55  ;;  %4137 = vmatpush3.bf16.msra.mxu1 %v4349_v56  ;;  %v4433_v55 = vld [vmem:[#allocation5 + $0x9c] ss:$24 sps:$4 sm:$0xff]   ;;  %v4428_v56 = vld [vmem:[#allocation5 + $0x90] ss:$24 sps:$4 sm:$0xff]  }
  0x73   :  { %489 = vmatprep.subr.bf16.mxu0 %v4352_v57  ;;  %4138 = vmatprep.subr.bf16.mxu1 %v4990_v38  ;;  %v4431_v57 = vld [vmem:[#allocation5 + $0x98] ss:$24 sps:$4 sm:$0xff]  }
  0x76   :  { %490 = vmatpush1.bf16.msra.mxu0 %v4350_v58  ;;  %4139 = vmatpush3.bf16.msra.mxu1 %v4353_v59  ;;  %v4436_v58 = vld [vmem:[#allocation5 + $0xc4] ss:$24 sps:$4 sm:$0xff]  }
  0x77   :  { %680 = vmatprep.subr.bf16.mxu0 %v4356_v61  ;;  %923 = vmatprep.subr.bf16.mxu1 %v4359_v62  ;;  %v4439_v59 = vld [vmem:[#allocation5 + $0xcc] ss:$24 sps:$4 sm:$0xff]   ;;  %v4437_v61 = vld [vmem:[#allocation5 + $0xc8] ss:$24 sps:$4 sm:$0xff]  }
  0x78   :  { %v4442_v62 = vld [vmem:[#allocation5 + $0xf4] ss:$24 sps:$4 sm:$0xff]  }
  0x79   :  { %508 = vmatmul.mubr.bf16.vlgmr.msra.gmra.mrb[4].mxu0 %v5087_v36  ;;  %4141 = vmatmul.mubr.bf16.vlgmr.msra.gmra.mrb[4].mxu1 %v5105_v2  ;;  %v4405_v36 = vld [vmem:[#allocation7 + $0x110] ss:$12 sps:$4 sm:$0xff]  }
  0x7a   :  { %681 = vmatpush1.bf16.msra.mxu0 %v4354_v63  ;;  %924 = vmatpush1.bf16.msra.mxu1 %v4357_v1  ;;  %v4445_v63 = vld [vmem:[#allocation5 + $0xfc] ss:$24 sps:$4 sm:$0xff]   ;;  %v4440_v1 = vld [vmem:[#allocation5 + $0xf0] ss:$24 sps:$4 sm:$0xff]  }
  0x7b   :  { %682 = vmatprep.subr.bf16.mxu0 %v4362_v3  ;;  %925 = vmatprep.subr.bf16.mxu1 %v4365_v4  ;;  %v4448_v3 = vld [vmem:[#allocation5 + $0x124] ss:$24 sps:$4 sm:$0xff]  }
  0x7c   :  { %712 = vmatprep.mubr.bf16.mxu0 %v4989_v0  ;;  %955 = vmatprep.mubr.bf16.mxu1 %v4989_v0  ;;  %v4451_v4 = vld [vmem:[#allocation5 + $0x12c] ss:$24 sps:$4 sm:$0xff]  }
  0x7e   :  { %683 = vmatpush1.bf16.msra.mxu0 %v4360_v5  ;;  %926 = vmatpush1.bf16.msra.mxu1 %v4363_v6  ;;  %v4446_v5 = vld [vmem:[#allocation5 + $0x120] ss:$24 sps:$4 sm:$0xff]  }
  0x7f   :  { %684 = vmatprep.subr.bf16.mxu0 %v4368_v7  ;;  %927 = vmatprep.subr.bf16.mxu1 %v4371_v8  ;;  %v4449_v6 = vld [vmem:[#allocation5 + $0x128] ss:$24 sps:$4 sm:$0xff]   ;;  %v4454_v7 = vld [vmem:[#allocation5 + $0x154] ss:$24 sps:$4 sm:$0xff]  }
  0x80   :  { %v4457_v8 = vld [vmem:[#allocation5 + $0x15c] ss:$24 sps:$4 sm:$0xff]  }
  0x82   :  { %685 = vmatpush1.bf16.msra.mxu0 %v4366_v9  ;;  %928 = vmatpush1.bf16.msra.mxu1 %v4369_v10  ;;  %v4452_v9 = vld [vmem:[#allocation5 + $0x150] ss:$24 sps:$4 sm:$0xff]  }
  0x83   :  { %686 = vmatprep.subr.bf16.mxu0 %v4374_v11  ;;  %929 = vmatprep.subr.bf16.mxu1 %v4377_v12  ;;  %v4455_v10 = vld [vmem:[#allocation5 + $0x158] ss:$24 sps:$4 sm:$0xff]   ;;  %v4460_v11 = vld [vmem:[#allocation5 + $0x184] ss:$24 sps:$4 sm:$0xff]  }
  0x84   :  { %v4463_v12 = vld [vmem:[#allocation5 + $0x18c] ss:$24 sps:$4 sm:$0xff]  }
  0x86   :  { %687 = vmatpush1.bf16.msra.mxu0 %v4372_v13  ;;  %930 = vmatpush1.bf16.msra.mxu1 %v4375_v14  ;;  %v4458_v13 = vld [vmem:[#allocation5 + $0x180] ss:$24 sps:$4 sm:$0xff]  }
  0x87   :  { %688 = vmatprep.subr.bf16.mxu0 %v4380_v15  ;;  %931 = vmatprep.subr.bf16.mxu1 %v4383_v16  ;;  %v4461_v14 = vld [vmem:[#allocation5 + $0x188] ss:$24 sps:$4 sm:$0xff]   ;;  %v4466_v15 = vld [vmem:[#allocation5 + $0x1b4] ss:$24 sps:$4 sm:$0xff]  }
  0x88   :  { %v4469_v16 = vld [vmem:[#allocation5 + $0x1bc] ss:$24 sps:$4 sm:$0xff]  }
  0x8a   :  { %689 = vmatpush1.bf16.msra.mxu0 %v4378_v17  ;;  %932 = vmatpush1.bf16.msra.mxu1 %v4381_v18  ;;  %v4464_v17 = vld [vmem:[#allocation5 + $0x1b0] ss:$24 sps:$4 sm:$0xff]  }
  0x8b   :  { %690 = vmatprep.subr.bf16.mxu0 %v4386_v19  ;;  %933 = vmatprep.subr.bf16.mxu1 %v4389_v20  ;;  %v4467_v18 = vld [vmem:[#allocation5 + $0x1b8] ss:$24 sps:$4 sm:$0xff]   ;;  %v4472_v19 = vld [vmem:[#allocation5 + $0x1e4] ss:$24 sps:$4 sm:$0xff]  }
  0x8c   :  { %v4475_v20 = vld [vmem:[#allocation5 + $0x1ec] ss:$24 sps:$4 sm:$0xff]  }
  0x8e   :  { %691 = vmatpush1.bf16.msra.mxu0 %v4384_v21  ;;  %934 = vmatpush1.bf16.msra.mxu1 %v4387_v22  ;;  %v4470_v21 = vld [vmem:[#allocation5 + $0x1e0] ss:$24 sps:$4 sm:$0xff]  }
  0x8f   :  { %692 = vmatprep.subr.bf16.mxu0 %v4392_v23  ;;  %935 = vmatprep.subr.bf16.mxu1 %v4395_v24  ;;  %v4473_v22 = vld [vmem:[#allocation5 + $0x1e8] ss:$24 sps:$4 sm:$0xff]   ;;  %v4478_v23 = vld [vmem:[#allocation5 + $0x214] ss:$24 sps:$4 sm:$0xff]  }
  0x90   :  { %v4481_v24 = vld [vmem:[#allocation5 + $0x21c] ss:$24 sps:$4 sm:$0xff]  }
  0x92   :  { %693 = vmatpush1.bf16.msra.mxu0 %v4390_v25  ;;  %936 = vmatpush1.bf16.msra.mxu1 %v4393_v26  ;;  %v4476_v25 = vld [vmem:[#allocation5 + $0x210] ss:$24 sps:$4 sm:$0xff]  }
  0x93   :  { %694 = vmatprep.subr.bf16.mxu0 %v4398_v27  ;;  %937 = vmatprep.subr.bf16.mxu1 %v4401_v28  ;;  %v4479_v26 = vld [vmem:[#allocation5 + $0x218] ss:$24 sps:$4 sm:$0xff]   ;;  %v4484_v28 = vld [vmem:[#allocation5 + $0x244] ss:$24 sps:$4 sm:$0xff]  }
  0x94   :  { %v4482_v27 = vld [vmem:[#allocation5 + $0x240] ss:$24 sps:$4 sm:$0xff]  }
  0x96   :  { %695 = vmatpush1.bf16.msra.mxu0 %v4396_v29  ;;  %938 = vmatpush1.bf16.msra.mxu1 %v4399_v30  ;;  %v4485_v29 = vld [vmem:[#allocation5 + $0x248] ss:$24 sps:$4 sm:$0xff]   ;;  %v4487_v30 = vld [vmem:[#allocation5 + $0x24c] ss:$24 sps:$4 sm:$0xff]  }
  0x97   :  { %4144 = vmatprep.subr.bf16.mxu0 %v4990_v38  ;;  %1665 = vmatprep.subr.bf16.mxu1 %v4412_v43  ;;  %v4503_v43 = vld [vmem:[#allocation5 + $0x2d8] ss:$24 sps:$4 sm:$0xff]  }
  0x99   :  { %713 = vmatmul.mubr.bf16.vlgmr.msra.gmra.mrb[0].mxu0 %v5105_v2  ;;  %956 = vmatmul.mubr.bf16.vlgmr.msra.gmra.mrb[8].mxu1 %v761_v33  ;;  %v4443_v2 = vld [vmem:[#allocation5 + $0xf8] ss:$24 sps:$4 sm:$0xff]  }
  0x9a   :  { %4145 = vmatpush3.bf16.msra.mxu0 %v4402_v32  ;;  %4160 = vmatprep.mubr.msk.bf16.mxu0 %vm4991_vm0, %v4990_v38  ;;  %v4493_v32 = vld [vmem:[#allocation5 + $0x27c] ss:$24 sps:$4 sm:$0xff]  }
  0x9b   :  { %4146 = vmatprep.subr.bf16.mxu0 %v4990_v38  ;;  %1666 = vmatpush1.bf16.msra.mxu1 %v4410_v42  ;;  %v4500_v42 = vld [vmem:[#allocation5 + $0x2d0] ss:$24 sps:$4 sm:$0xff]  }
  0x9c   :  { %1667 = vmatprep.subr.bf16.mxu1 %v4418_v47 }
  0x9e   :  { %4147 = vmatpush3.bf16.msra.mxu0 %v4403_v34  ;;  %v4491_v34 = vld [vmem:[#allocation5 + $0x278] ss:$24 sps:$4 sm:$0xff]  }
  0x9f   :  { %4148 = vmatprep.subr.bf16.mxu0 %v4990_v38  ;;  %1668 = vmatpush1.bf16.msra.mxu1 %v4416_v46 }
  0xa0   :  { %1669 = vmatprep.subr.bf16.mxu1 %v4424_v50 }
  0xa2   :  { %4149 = vmatpush3.bf16.msra.mxu0 %v4404_v35  ;;  %v4496_v35 = vld [vmem:[#allocation5 + $0x2a4] ss:$24 sps:$4 sm:$0xff]  }
  0xa3   :  { %4150 = vmatprep.subr.bf16.mxu0 %v4990_v38  ;;  %1670 = vmatpush1.bf16.msra.mxu1 %v4422_v52 }
  0xa4   :  { %1671 = vmatprep.subr.bf16.mxu1 %v4430_v54 }
  0xa6   :  { %4151 = vmatpush3.bf16.msra.mxu0 %v4405_v36  ;;  %v4499_v36 = vld [vmem:[#allocation5 + $0x2ac] ss:$24 sps:$4 sm:$0xff]  }
  0xa7   :  { %4152 = vmatprep.subr.bf16.mxu0 %v4990_v38  ;;  %1672 = vmatpush1.bf16.msra.mxu1 %v4428_v56 }
  0xa8   :  { %1673 = vmatprep.subr.bf16.mxu1 %v4436_v58 }
  0xaa   :  { %4153 = vmatpush3.bf16.msra.mxu0 %v4406_v37  ;;  %v4494_v37 = vld [vmem:[#allocation5 + $0x2a0] ss:$24 sps:$4 sm:$0xff]  }
  0xab   :  { %4154 = vmatprep.subr.bf16.mxu0 %v4990_v38  ;;  %1674 = vmatpush1.bf16.msra.mxu1 %v4434_v60  ;;  %v121_v60 = vld [vmem:[%s5344_s5] sm:$0x3f] }
  0xac   :  { %1675 = vmatprep.subr.bf16.mxu1 %v4442_v62 }
  0xae   :  { %4155 = vmatpush3.bf16.msra.mxu0 %v4407_v39  ;;  %v4497_v39 = vld [vmem:[#allocation5 + $0x2a8] ss:$24 sps:$4 sm:$0xff]  }
  0xaf   :  { %4156 = vmatprep.subr.bf16.mxu0 %v4990_v38  ;;  %1676 = vmatpush1.bf16.msra.mxu1 %v4440_v1 }
  0xb0   :  { %1677 = vmatprep.subr.bf16.mxu1 %v4448_v3 }
  0xb2   :  { %4157 = vmatpush3.bf16.msra.mxu0 %v4408_v40  ;;  %v4502_v40 = vld [vmem:[#allocation5 + $0x2d4] ss:$24 sps:$4 sm:$0xff]  }
  0xb3   :  { %4158 = vmatprep.subr.bf16.mxu0 %v4990_v38  ;;  %1678 = vmatpush1.bf16.msra.mxu1 %v4446_v5 }
  0xb4   :  { %1679 = vmatprep.subr.bf16.mxu1 %v4454_v7 }
  0xb6   :  { %4159 = vmatpush3.bf16.msra.mxu0 %v4409_v41  ;;  %v4505_v41 = vld [vmem:[#allocation5 + $0x2dc] ss:$24 sps:$4 sm:$0xff]  }
  0xb7   :  { %1706 = vmatprep.subr.bf16.mxu0 %v4415_v45  ;;  %1680 = vmatpush1.bf16.msra.mxu1 %v4452_v9 }
  0xb8   :  { %1681 = vmatprep.subr.bf16.mxu1 %v4460_v11 }
  0xb9   :  { %4161 = vmatmul.mubr.bf16.vlgmr.msra.gmra.mrb[8].mxu0 %v761_v33  ;;  %v4488_v33 = vld [vmem:[#allocation5 + $0x270] ss:$24 sps:$4 sm:$0xff]  }
  0xba   :  { %1707 = vmatpush1.bf16.msra.mxu0 %v4413_v44  ;;  %v4508_v44 = vld [vmem:[#allocation5 + $0x14] ss:$24 sps:$4 sm:$0xff]  }
  0xbb   :  { %1708 = vmatprep.subr.bf16.mxu0 %v4421_v49  ;;  %1682 = vmatpush1.bf16.msra.mxu1 %v4458_v13 }
  0xbc   :  { %1683 = vmatprep.subr.bf16.mxu1 %v4466_v15 }
  0xbe   :  { %1709 = vmatpush1.bf16.msra.mxu0 %v4419_v48 }
  0xbf   :  { %1710 = vmatprep.subr.bf16.mxu0 %v4427_v51  ;;  %1684 = vmatpush1.bf16.msra.mxu1 %v4464_v17 }
  0xc0   :  { %1685 = vmatprep.subr.bf16.mxu1 %v4472_v19 }
  0xc2   :  { %1711 = vmatpush1.bf16.msra.mxu0 %v4425_v53 }
  0xc3   :  { %1712 = vmatprep.subr.bf16.mxu0 %v4433_v55  ;;  %1686 = vmatpush1.bf16.msra.mxu1 %v4470_v21 }
  0xc4   :  { %1687 = vmatprep.subr.bf16.mxu1 %v4478_v23 }
  0xc6   :  { %1713 = vmatpush1.bf16.msra.mxu0 %v4431_v57  ;;  %v363_v57 = vlaneseq }
  0xc7   :  { %1714 = vmatprep.subr.bf16.mxu0 %v4439_v59  ;;  %1688 = vmatpush1.bf16.msra.mxu1 %v4476_v25 }
  0xc8   :  { %1689 = vmatprep.subr.bf16.mxu1 %v4484_v28  ;;  %v5129_v58 = vshrl.u32 %v363_v57, 7  ;;  %vm3623_vm6 = vcmp.lt.s32.totalorder %v363_v57, 256 }
  0xca   :  { %1715 = vmatpush1.bf16.msra.mxu0 %v4437_v61  ;;  %v5132_v59 = vsub.s32 3, %v5129_v58  ;;  %v5138_v61 = vsub.s32 4, %v5129_v58  ;;  %v5141_v62 = vsub.s32 0, %v5129_v58 }
  0xcb   :  { %1716 = vmatprep.subr.bf16.mxu0 %v4445_v63  ;;  %1690 = vmatpush1.bf16.msra.mxu1 %v4482_v27  ;;  %v5151_v27 = vsub.s32 2, %v5129_v58 }
  0xcc   :  { %1691 = vmatprep.subr.bf16.mxu1 %v4490_v31  ;;  %v378_v63 = vrot.slane %v121_v60, %v5132_v59  ;;  %v382_v1 = vrot.slane %v121_v60, %v5138_v61  ;;  %v366_v3 = vrot.slane %v121_v60, %v5141_v62 }
  0xce   :  { %1717 = vmatpush1.bf16.msra.mxu0 %v4443_v2  ;;  %v5146_v2 = vsub.s32 1, %v5129_v58 }
  0xcf   :  { %1718 = vmatprep.subr.bf16.mxu0 %v4451_v4  ;;  %1692 = vmatpush1.bf16.msra.mxu1 %v4488_v33  ;;  %v5158_v33 = vsub.s32 5, %v5129_v58 }
  0xd0   :  { %1693 = vmatprep.subr.bf16.mxu1 %v4496_v35 }
  0xd2   :  { %1719 = vmatpush1.bf16.msra.mxu0 %v4449_v6 }
  0xd3   :  { %1720 = vmatprep.subr.bf16.mxu0 %v4457_v8  ;;  %1694 = vmatpush1.bf16.msra.mxu1 %v4494_v37  ;;  %v370_v8 = vrot.slane %v121_v60, %v5146_v2 }
  0xd4   :  { %1695 = vmatprep.subr.bf16.mxu1 %v4502_v40  ;;  %v386_v40 = vrot.slane %v121_v60, %v5158_v33 }
  0xd6   :  { %1721 = vmatpush1.bf16.msra.mxu0 %v4455_v10 }
  0xd7   :  { %1722 = vmatprep.subr.bf16.mxu0 %v4463_v12  ;;  %1696 = vmatpush1.bf16.msra.mxu1 %v4500_v42 }
  0xd8   :  { %1747 = vmatprep.subr.bf16.mxu1 %v4508_v44 }
  0xda   :  { %1723 = vmatpush1.bf16.msra.mxu0 %v4461_v14 }
  0xdb   :  { %1724 = vmatprep.subr.bf16.mxu0 %v4469_v16 }
  0xde   :  { %1725 = vmatpush1.bf16.msra.mxu0 %v4467_v18 }
  0xdf   :  { %1726 = vmatprep.subr.bf16.mxu0 %v4475_v20 }
  0xe2   :  { %1727 = vmatpush1.bf16.msra.mxu0 %v4473_v22 }
  0xe3   :  { %1728 = vmatprep.subr.bf16.mxu0 %v4481_v24 }
  0xe6   :  { %1729 = vmatpush1.bf16.msra.mxu0 %v4479_v26 }
  0xe7   :  { %1730 = vmatprep.subr.bf16.mxu0 %v4487_v30  ;;  %v374_v30 = vrot.slane %v121_v60, %v5151_v27  ;;  %v4886_v60 = vld [vmem:[%s5340_s1] sm:$0x1] }
  0xea   :  { %1731 = vmatpush1.bf16.msra.mxu0 %v4485_v29  ;;  %v516_v29 = vld [vmem:[%s5345_s6] sm:$0x3] }
  0xeb   :  { %1732 = vmatprep.subr.bf16.mxu0 %v4493_v32 }
  0xee   :  { %1733 = vmatpush1.bf16.msra.mxu0 %v4491_v34 }
  0xef   :  { %1734 = vmatprep.subr.bf16.mxu0 %v4499_v36 }
  0xf2   :  { %1735 = vmatpush1.bf16.msra.mxu0 %v4497_v39  ;;  %v1030_v39 = vrot.slane %v516_v29, %v5146_v2 }
  0xf3   :  { %1736 = vmatprep.subr.bf16.mxu0 %v4505_v41 }
  0xf6   :  { %1737 = vmatpush1.bf16.msra.mxu0 %v4503_v43 }
  0xf7   :  { %4164 = vmatprep.subr.bf16.mxu0 %v4990_v38 }
 0x12c   :  { %v468_v45 = vpop.f32.mrb[0].mxu1 }
 0x12d   :  { %v470_v46 = vpop.f32.mrb[1].mxu1  ;;  %v469_v36 = vadd.f32 %v468_v45, %v374_v30  ;;  %v4529_v30 = vld [vmem:[#allocation7 + $0x200] ss:$12 sps:$4 sm:$0xff]  }
 0x12e   :  { %v472_v47 = vpop.f32.mrb[2].mxu1  ;;  %v471_v4 = vadd.f32 %v470_v46, %v378_v63 }
 0x12f   :  { %v473_v48 = vpop.f32.mrb[3].mxu1 }
 0x14c   :  { %v509_v49 = vpop.f32.mrb[4].mxu0  ;;  %v755_v50 = vpop.f32.mrb[4].mxu1 }
 0x14d   :  { %v5126_v51 = vpop.f32.mrb[5].mxu0  ;;  %v4142_v52 = vpop.f32.mrb[5].mxu1  ;;  %v510_v5 = vadd.f32 %v509_v49, %v382_v1  ;;  %v1004_v34 = vadd.f32 %v755_v50, %v516_v29  ;;  %v4526_v29 = vld [vmem:[#allocation5 + $0x100] ss:$24 sps:$4 sm:$0xff]  }
 0x14e   :  { %v513_v53 = vpop.f32.mrb[6].mxu0  ;;  %v758_v54 = vpop.f32.mrb[6].mxu1  ;;  %v512_v49 = vadd.f32 %v5126_v51, %v386_v40  ;;  %v4887_v51 = vld [vmem:[%s5340_s1 + $0x1] sm:$0x1]  ;;  %v4540_v40 = vld [vmem:[#allocation5 + $0x194] ss:$24 sps:$4 sm:$0xff]  }
 0x14f   :  { %v514_v55 = vpop.f32.mrb[7].mxu0  ;;  %v4143_v56 = vpop.f32.mrb[7].mxu1 }
 0x16c   :  { %v714_v6 = vpop.f32.mrb[0].mxu0  ;;  %v957_v7 = vpop.f32.mrb[8].mxu1 }
 0x16d   :  { %v4244_v9 = vadd.f32 %v714_v6, %v366_v3  ;;  %v1033_v10 = vadd.f32 %v957_v7, %v471_v4  ;;  %v716_v11 = vpop.f32.mrb[1].mxu0  ;;  %v959_v12 = vpop.f32.mrb[9].mxu1 }
 0x16e   :  { %v1040_v13 = vadd.f32 %v959_v12, %v510_v5  ;;  %v718_v14 = vpop.f32.mrb[2].mxu0  ;;  %v961_v15 = vpop.f32.mrb[10].mxu1  ;;  %v4245_v20 = vadd.f32 %v716_v11, %v370_v8  ;;  %v4506_v11 = vld [vmem:[#allocation5 + $0x10] ss:$24 sps:$4 sm:$0xff]  }
 0x16f   :  { %v3766_v16 = vmul.f32 -1.442695, %v4244_v9  ;;  %v3768_v17 = vmul.f32 -1.442695, %v1033_v10  ;;  %v719_v18 = vpop.f32.mrb[3].mxu0  ;;  %v962_v19 = vpop.f32.mrb[11].mxu1 }
 0x170   :  { %v3767_v21 = vmul.f32 -1.442695, %v4245_v20  ;;  %v3769_v22 = vmul.f32 -1.442695, %v1040_v13  ;;  %v4509_v12 = vld [vmem:[#allocation7 + $0x188] ss:$12 sps:$4 sm:$0xff]  }
 0x171   :  { %4826 = vpow2.f32 %v3766_v16  ;;  %v4512_v14 = vld [vmem:[#allocation5 + $0x44] ss:$24 sps:$4 sm:$0xff]   ;;  %v4510_v16 = vld [vmem:[#allocation5 + $0x40] ss:$24 sps:$4 sm:$0xff]   ;;  %v4516_v18 = vld [vmem:[#allocation5 + $0x74] ss:$24 sps:$4 sm:$0xff]  }
 0x172   :  { %4828 = vpow2.f32 %v3768_v17  ;;  %v4513_v17 = vld [vmem:[#allocation7 + $0x1a0] ss:$12 sps:$4 sm:$0xff]   ;;  %v4514_v19 = vld [vmem:[#allocation5 + $0x70] ss:$24 sps:$4 sm:$0xff]   ;;  %v4517_v20 = vld [vmem:[#allocation7 + $0x1b8] ss:$12 sps:$4 sm:$0xff]  }
 0x173   :  { %4830 = vpow2.f32 %v3767_v21  ;;  %v4520_v21 = vld [vmem:[#allocation5 + $0xa4] ss:$24 sps:$4 sm:$0xff]  }
 0x174   :  { %4832 = vpow2.f32 %v3769_v22  ;;  %v4518_v22 = vld [vmem:[#allocation5 + $0xa0] ss:$24 sps:$4 sm:$0xff]  }
 0x17b   :  { %v4827_v23 = vpop.eup %4826 }
 0x17c   :  { %v1009_v24 = vadd.f32 1.0, %v4827_v23  ;;  %v4829_v25 = vpop.eup %4828  ;;  %v4521_v23 = vld [vmem:[#allocation7 + $0x1d0] ss:$12 sps:$4 sm:$0xff]  }
 0x17d   :  { %v1037_v26 = vadd.f32 1.0, %v4829_v25  ;;  %v4831_v28 = vpop.eup %4830  ;;  %v4522_v25 = vld [vmem:[#allocation5 + $0xd0] ss:$24 sps:$4 sm:$0xff]  }
 0x17e   :  { %4834 = vrcp.f32 %v1009_v24  ;;  %v1016_v31 = vadd.f32 1.0, %v4831_v28  ;;  %v4833_v32 = vpop.eup %4832  ;;  %v4524_v24 = vld [vmem:[#allocation5 + $0xd4] ss:$24 sps:$4 sm:$0xff]   ;;  %v4528_v28 = vld [vmem:[#allocation5 + $0x104] ss:$24 sps:$4 sm:$0xff]  }
 0x17f   :  { %4836 = vrcp.f32 %v1037_v26  ;;  %v1044_v42 = vadd.f32 1.0, %v4833_v32  ;;  %v4525_v26 = vld [vmem:[#allocation7 + $0x1e8] ss:$12 sps:$4 sm:$0xff]  }
 0x180   :  { %4838 = vrcp.f32 %v1016_v31  ;;  %v4532_v31 = vld [vmem:[#allocation5 + $0x134] ss:$24 sps:$4 sm:$0xff]   ;;  %v4530_v32 = vld [vmem:[#allocation5 + $0x130] ss:$24 sps:$4 sm:$0xff]  }
 0x188   :  { %v4835_v35 = vpop.eup %4834 }
 0x189   :  { %v1019_v37 = vmul.f32 %v4835_v35, %v1004_v34  ;;  %v4837_v47 = vpop.eup %4836  ;;  %v4533_v34 = vld [vmem:[#allocation7 + $0x218] ss:$12 sps:$4 sm:$0xff]  }
 0x18a   :  { %v4839_v53 = vpop.eup %4838  ;;  %v4536_v35 = vld [vmem:[#allocation5 + $0x164] ss:$24 sps:$4 sm:$0xff]  }
 0x18b   :  { %v1020_v41 = vadd.f32 %v1019_v37, %v469_v36  ;;  %v1022_v54 = vsub.f32 1.0, %v4839_v53  ;;  %v1024_v63 = vmul.f32 %v4886_v60, %v4839_v53  ;;  %v4534_v36 = vld [vmem:[#allocation5 + $0x160] ss:$24 sps:$4 sm:$0xff]   ;;  %v4537_v37 = vld [vmem:[#allocation7 + $0x230] ss:$12 sps:$4 sm:$0xff]  }
 0x18c   :  { %v998_v43 = vpop.f32.mrb[8].mxu0  ;;  %v4553_v53 = vld [vmem:[#allocation7 + $0x270] ss:$12 sps:$4 sm:$0xff]   ;;  %v4559_v60 = vld [vmem:[#allocation7 + $0x288] ss:$12 sps:$4 sm:$0xff]  }
 0x18d   :  { %4840 = vtanh.f32 %v1020_v41  ;;  %v1032_v44 = vadd.f32 %v1030_v39, %v998_v43  ;;  %v4162_v46 = vpop.f32.mrb[9].mxu0  ;;  %v5186_v39 = vld [vmem:[%s5340_s1 + $0x2] sm:$0x1]  ;;  %v4543_v41 = vld [vmem:[#allocation7 + $0x244] ss:$12 sps:$4 sm:$0xff]  }
 0x18e   :  { %v1001_v48 = vpop.f32.mrb[10].mxu0  ;;  %4842 = vrcp.f32 %v1044_v42  ;;  %v5191_v42 = vpack.c.bf16 %v5186_v39, %v5186_v39  ;;  %v4538_v43 = vld [vmem:[#allocation5 + $0x190] ss:$24 sps:$4 sm:$0xff]   ;;  %v4546_v46 = vld [vmem:[#allocation5 + $0x1c4] ss:$24 sps:$4 sm:$0xff]  }
 0x18f   :  { %v1047_v50 = vmul.f32 %v4837_v47, %v1032_v44  ;;  %v4163_v52 = vpop.f32.mrb[11].mxu0  ;;  %v4541_v44 = vld [vmem:[#allocation7 + $0x240] ss:$12 sps:$4 sm:$0xff]   ;;  %v4549_v47 = vld [vmem:[#allocation7 + $0x25c] ss:$12 sps:$4 sm:$0xff]  }
 0x190   :  { %v4544_v48 = vld [vmem:[#allocation5 + $0x1c0] ss:$24 sps:$4 sm:$0xff]  }
 0x191   :  { %v1048_v45 = vadd.f32 %v1047_v50, %v512_v49  ;;  %v4547_v49 = vld [vmem:[#allocation7 + $0x258] ss:$12 sps:$4 sm:$0xff]   ;;  %v4552_v50 = vld [vmem:[#allocation5 + $0x1f4] ss:$24 sps:$4 sm:$0xff]  }
 0x192   :  { %v4555_v52 = vld [vmem:[#allocation7 + $0x274] ss:$12 sps:$4 sm:$0xff]  }
 0x193   :  { %4844 = vtanh.f32 %v1048_v45  ;;  %v4550_v45 = vld [vmem:[#allocation5 + $0x1f0] ss:$24 sps:$4 sm:$0xff]  }
 0x197   :  { %v4841_v55 = vpop.eup %4840 }
 0x198   :  { %v1023_v56 = vmul.f32 %v4841_v55, %v1022_v54  ;;  %v4843_v1 = vpop.eup %4842  ;;  %v4558_v54 = vld [vmem:[#allocation5 + $0x224] ss:$24 sps:$4 sm:$0xff]   ;;  %v4561_v55 = vld [vmem:[#allocation7 + $0x28c] ss:$12 sps:$4 sm:$0xff]  }
 0x199   :  { %v1050_v4 = vsub.f32 1.0, %v4843_v1  ;;  %v1052_v7 = vmul.f32 %v4887_v51, %v4843_v1  ;;  %v4567_v1 = vld [vmem:[#allocation7 + $0x2a4] ss:$12 sps:$4 sm:$0xff]   ;;  %v4568_v51 = vld [vmem:[#allocation5 + $0x280] ss:$24 sps:$4 sm:$0xff]  }
 0x19a   :  { %v1025_v3 = vadd.f32 %v1024_v63, %v1023_v56  ;;  %v4556_v56 = vld [vmem:[#allocation5 + $0x220] ss:$24 sps:$4 sm:$0xff]   ;;  %v4564_v63 = vld [vmem:[#allocation5 + $0x254] ss:$24 sps:$4 sm:$0xff]  }
 0x19c   :  { %v5169_v13 = vpack.c.bf16 %v1025_v3, %v1025_v3 }
 0x19d   :  { %v4845_v5 = vpop.eup %4844 }
 0x19e   :  { %v1051_v6 = vmul.f32 %v4845_v5, %v1050_v4  ;;  %v4565_v4 = vld [vmem:[#allocation7 + $0x2a0] ss:$12 sps:$4 sm:$0xff]   ;;  %v4570_v5 = vld [vmem:[#allocation5 + $0x284] ss:$24 sps:$4 sm:$0xff]  }
 0x1a0   :  { %v1053_v8 = vadd.f32 %v1052_v7, %v1051_v6  ;;  %v4573_v6 = vld [vmem:[#allocation7 + $0x2bc] ss:$12 sps:$4 sm:$0xff]   ;;  %v4571_v7 = vld [vmem:[#allocation7 + $0x2b8] ss:$12 sps:$4 sm:$0xff]  }
 0x1a2   :  { %v1055_v9 = vpack.c.bf16 %v1053_v8, %v1053_v8  ;;  %v3627_v10 = vrot.slane %v1053_v8, 7  ;;  %v4576_v8 = vld [vmem:[#allocation5 + $0x2b4] ss:$24 sps:$4 sm:$0xff]  }
 0x1a4   :  { %1697 = vmatprep.mubr.bf16.mxu1 %v1055_v9  ;;  %1738 = vmatprep.mubr.bf16.mxu0 %v1055_v9  ;;  %v5171_v15 = vsel %vm3639_vm1, %v1025_v3, %v3627_v10  ;;  %v4562_v3 = vld [vmem:[#allocation5 + $0x250] ss:$24 sps:$4 sm:$0xff]  }
 0x1a5   :  { %1698 = vmatmul.mubr.bf16.vlgmr.msra.gmra.mrb[12].mxu1 %v5169_v13  ;;  %1739 = vmatmul.mubr.bf16.vlgmr.msra.gmra.mrb[12].mxu0 %v5169_v13  ;;  %v4574_v10 = vld [vmem:[#allocation5 + $0x2b0] ss:$24 sps:$4 sm:$0xff]  }
 0x1a6   :  { %1748 = vmatpush1.bf16.msra.mxu1 %v4506_v11  ;;  %4165 = vmatpush3.bf16.msra.mxu0 %v4509_v12  ;;  %v4577_v11 = vld [vmem:[#allocation7 + $0x2d0] ss:$12 sps:$4 sm:$0xff]  }
 0x1a7   :  { %1779 = vmatprep.mubr.bf16.mxu1 %v1055_v9  ;;  %1749 = vmatprep.subr.bf16.mxu1 %v4512_v14  ;;  %v4579_v9 = vld [vmem:[#allocation7 + $0x2d4] ss:$12 sps:$4 sm:$0xff]   ;;  %v4582_v12 = vld [vmem:[#allocation5 + $0x2e4] ss:$24 sps:$4 sm:$0xff]   ;;  %v4585_v14 = vld [vmem:[#allocation7 + $0x2ec] ss:$12 sps:$4 sm:$0xff]  }
 0x1a8   :  { %4166 = vmatprep.subr.bf16.mxu0 %v4990_v38  ;;  %4180 = vmatprep.mubr.msk.bf16.mxu0 %vm4991_vm0, %v4990_v38 }
 0x1aa   :  { %1750 = vmatpush1.bf16.msra.mxu1 %v4510_v16  ;;  %4167 = vmatpush3.bf16.msra.mxu0 %v4513_v17  ;;  %v4580_v16 = vld [vmem:[#allocation5 + $0x2e0] ss:$24 sps:$4 sm:$0xff]   ;;  %v4583_v17 = vld [vmem:[#allocation7 + $0x2e8] ss:$12 sps:$4 sm:$0xff]  }
 0x1ab   :  { %1751 = vmatprep.subr.bf16.mxu1 %v4516_v18  ;;  %4168 = vmatprep.subr.bf16.mxu0 %v4990_v38  ;;  %v5198_v18 = vld [vmem:[%s5340_s1 + $0x3] sm:$0x1] }
 0x1ae   :  { %1752 = vmatpush1.bf16.msra.mxu1 %v4514_v19  ;;  %4169 = vmatpush3.bf16.msra.mxu0 %v4517_v20  ;;  %v4588_v19 = vld [vmem:[#allocation7 + $0x184] ss:$12 sps:$4 sm:$0xff]   ;;  %v2035_v20 = vpack.c.bf16 %v5198_v18, %v5198_v18 }
 0x1af   :  { %1753 = vmatprep.subr.bf16.mxu1 %v4520_v21  ;;  %4170 = vmatprep.subr.bf16.mxu0 %v4990_v38  ;;  %v4586_v21 = vld [vmem:[#allocation7 + $0x180] ss:$12 sps:$4 sm:$0xff]  }
 0x1b2   :  { %1754 = vmatpush1.bf16.msra.mxu1 %v4518_v22  ;;  %4171 = vmatpush3.bf16.msra.mxu0 %v4521_v23  ;;  %v4589_v22 = vld [vmem:[#allocation7 + $0x248] ss:$12 sps:$4 sm:$0xff]  }
 0x1b3   :  { %1755 = vmatprep.subr.bf16.mxu1 %v4524_v24  ;;  %4172 = vmatprep.subr.bf16.mxu0 %v4990_v38  ;;  %v4592_v23 = vld [vmem:[#allocation7 + $0x19c] ss:$12 sps:$4 sm:$0xff]   ;;  %v4590_v24 = vld [vmem:[#allocation7 + $0x198] ss:$12 sps:$4 sm:$0xff]  }
 0x1b6   :  { %1756 = vmatpush1.bf16.msra.mxu1 %v4522_v25  ;;  %4173 = vmatpush3.bf16.msra.mxu0 %v4525_v26  ;;  %v4593_v25 = vld [vmem:[#allocation7 + $0x260] ss:$12 sps:$4 sm:$0xff]  }
 0x1b7   :  { %1757 = vmatprep.subr.bf16.mxu1 %v4528_v28  ;;  %4174 = vmatprep.subr.bf16.mxu0 %v4990_v38  ;;  %v4596_v26 = vld [vmem:[#allocation7 + $0x1b4] ss:$12 sps:$4 sm:$0xff]   ;;  %v4594_v28 = vld [vmem:[#allocation7 + $0x1b0] ss:$12 sps:$4 sm:$0xff]  }
 0x1ba   :  { %1758 = vmatpush1.bf16.msra.mxu1 %v4526_v29  ;;  %4175 = vmatpush3.bf16.msra.mxu0 %v4529_v30  ;;  %v4597_v29 = vld [vmem:[#allocation7 + $0x278] ss:$12 sps:$4 sm:$0xff]   ;;  %v4598_v30 = vld [vmem:[#allocation7 + $0x1c8] ss:$12 sps:$4 sm:$0xff]  }
 0x1bb   :  { %1759 = vmatprep.subr.bf16.mxu1 %v4532_v31  ;;  %4176 = vmatprep.subr.bf16.mxu0 %v4990_v38  ;;  %v4601_v31 = vld [vmem:[#allocation7 + $0x290] ss:$12 sps:$4 sm:$0xff]  }
 0x1be   :  { %1760 = vmatpush1.bf16.msra.mxu1 %v4530_v32  ;;  %4177 = vmatpush3.bf16.msra.mxu0 %v4533_v34  ;;  %v4604_v32 = vld [vmem:[#allocation7 + $0x1e4] ss:$12 sps:$4 sm:$0xff]   ;;  %v4602_v34 = vld [vmem:[#allocation7 + $0x1e0] ss:$12 sps:$4 sm:$0xff]  }
 0x1bf   :  { %1761 = vmatprep.subr.bf16.mxu1 %v4536_v35  ;;  %4178 = vmatprep.subr.bf16.mxu0 %v4990_v38  ;;  %v4605_v35 = vld [vmem:[#allocation7 + $0x2a8] ss:$12 sps:$4 sm:$0xff]  }
 0x1c2   :  { %1762 = vmatpush1.bf16.msra.mxu1 %v4534_v36  ;;  %4179 = vmatpush3.bf16.msra.mxu0 %v4537_v37  ;;  %v4608_v36 = vld [vmem:[#allocation7 + $0x1fc] ss:$12 sps:$4 sm:$0xff]   ;;  %v4606_v37 = vld [vmem:[#allocation7 + $0x1f8] ss:$12 sps:$4 sm:$0xff]  }
 0x1c3   :  { %1763 = vmatprep.subr.bf16.mxu1 %v4540_v40  ;;  %2197 = vmatprep.subr.bf16.mxu0 %v4543_v41  ;;  %v4609_v40 = vld [vmem:[#allocation7 + $0x2c0] ss:$12 sps:$4 sm:$0xff]  }
 0x1c4   :  { %v4612_v41 = vld [vmem:[#allocation7 + $0x214] ss:$12 sps:$4 sm:$0xff]  }
 0x1c5   :  { %4181 = vmatmul.mubr.bf16.vlgmr.msra.gmra.mrb[16].mxu0 %v5191_v42 }
 0x1c6   :  { %1764 = vmatpush1.bf16.msra.mxu1 %v4538_v43  ;;  %2198 = vmatpush1.bf16.msra.mxu0 %v4541_v44  ;;  %v4610_v43 = vld [vmem:[#allocation7 + $0x210] ss:$12 sps:$4 sm:$0xff]   ;;  %v4613_v44 = vld [vmem:[#allocation7 + $0x2d8] ss:$12 sps:$4 sm:$0xff]  }
 0x1c7   :  { %1765 = vmatprep.subr.bf16.mxu1 %v4546_v46  ;;  %2199 = vmatprep.subr.bf16.mxu0 %v4549_v47  ;;  %v4616_v46 = vld [vmem:[#allocation7 + $0x22c] ss:$12 sps:$4 sm:$0xff]   ;;  %v4614_v47 = vld [vmem:[#allocation7 + $0x228] ss:$12 sps:$4 sm:$0xff]  }
 0x1c8   :  { %2229 = vmatprep.mubr.bf16.mxu0 %v4989_v0 }
 0x1ca   :  { %1766 = vmatpush1.bf16.msra.mxu1 %v4544_v48  ;;  %2200 = vmatpush1.bf16.msra.mxu0 %v4547_v49  ;;  %v4617_v48 = vld [vmem:[#allocation7 + $0x2f0] ss:$12 sps:$4 sm:$0xff]  }
 0x1cb   :  { %1767 = vmatprep.subr.bf16.mxu1 %v4552_v50  ;;  %2201 = vmatprep.subr.bf16.mxu0 %v4555_v52  ;;  %v4620_v49 = vld [vmem:[#allocation5 + $0x304] ss:$24 sps:$4 sm:$0xff]   ;;  %v4618_v52 = vld [vmem:[#allocation5 + $0x300] ss:$24 sps:$4 sm:$0xff]  }
 0x1cc   :  { %v4623_v50 = vld [vmem:[#allocation5 + $0x30c] ss:$24 sps:$4 sm:$0xff]  }
 0x1ce   :  { %1768 = vmatpush1.bf16.msra.mxu1 %v4550_v45  ;;  %2202 = vmatpush1.bf16.msra.mxu0 %v4553_v53  ;;  %v4621_v45 = vld [vmem:[#allocation5 + $0x308] ss:$24 sps:$4 sm:$0xff]  }
 0x1cf   :  { %1769 = vmatprep.subr.bf16.mxu1 %v4558_v54  ;;  %2203 = vmatprep.subr.bf16.mxu0 %v4561_v55  ;;  %v4624_v53 = vld [vmem:[#allocation5 + $0x330] ss:$24 sps:$4 sm:$0xff]   ;;  %v4626_v54 = vld [vmem:[#allocation5 + $0x334] ss:$24 sps:$4 sm:$0xff]  }
 0x1d0   :  { %v4627_v55 = vld [vmem:[#allocation5 + $0x338] ss:$24 sps:$4 sm:$0xff]  }
 0x1d2   :  { %1770 = vmatpush1.bf16.msra.mxu1 %v4556_v56  ;;  %2204 = vmatpush1.bf16.msra.mxu0 %v4559_v60  ;;  %v4629_v56 = vld [vmem:[#allocation5 + $0x33c] ss:$24 sps:$4 sm:$0xff]  }
 0x1d3   :  { %1771 = vmatprep.subr.bf16.mxu1 %v4564_v63  ;;  %2205 = vmatprep.subr.bf16.mxu0 %v4567_v1  ;;  %v4632_v60 = vld [vmem:[#allocation5 + $0x364] ss:$24 sps:$4 sm:$0xff]   ;;  %v4630_v1 = vld [vmem:[#allocation5 + $0x360] ss:$24 sps:$4 sm:$0xff]  }
 0x1d4   :  { %v4635_v63 = vld [vmem:[#allocation5 + $0x36c] ss:$24 sps:$4 sm:$0xff]  }
 0x1d6   :  { %1772 = vmatpush1.bf16.msra.mxu1 %v4562_v3  ;;  %2206 = vmatpush1.bf16.msra.mxu0 %v4565_v4  ;;  %v4638_v3 = vld [vmem:[#allocation5 + $0x394] ss:$24 sps:$4 sm:$0xff]  }
 0x1d7   :  { %1773 = vmatprep.subr.bf16.mxu1 %v4570_v5  ;;  %2207 = vmatprep.subr.bf16.mxu0 %v4573_v6  ;;  %v4641_v4 = vld [vmem:[#allocation5 + $0x39c] ss:$24 sps:$4 sm:$0xff]   ;;  %v4636_v5 = vld [vmem:[#allocation5 + $0x390] ss:$24 sps:$4 sm:$0xff]  }
 0x1d8   :  { %v4639_v6 = vld [vmem:[#allocation5 + $0x398] ss:$24 sps:$4 sm:$0xff]  }
 0x1da   :  { %1774 = vmatpush1.bf16.msra.mxu1 %v4568_v51  ;;  %2208 = vmatpush1.bf16.msra.mxu0 %v4571_v7  ;;  %v4644_v51 = vld [vmem:[#allocation5 + $0x3c4] ss:$24 sps:$4 sm:$0xff]  }
 0x1db   :  { %1775 = vmatprep.subr.bf16.mxu1 %v4576_v8  ;;  %2209 = vmatprep.subr.bf16.mxu0 %v4579_v9  ;;  %v4647_v7 = vld [vmem:[#allocation5 + $0x3cc] ss:$24 sps:$4 sm:$0xff]   ;;  %v4642_v8 = vld [vmem:[#allocation5 + $0x3c0] ss:$24 sps:$4 sm:$0xff]  }
 0x1dc   :  { %v4645_v9 = vld [vmem:[#allocation5 + $0x3c8] ss:$24 sps:$4 sm:$0xff]  }
 0x1de   :  { %1776 = vmatpush1.bf16.msra.mxu1 %v4574_v10  ;;  %2210 = vmatpush1.bf16.msra.mxu0 %v4577_v11  ;;  %v4650_v10 = vld [vmem:[#allocation5 + $0x3f4] ss:$24 sps:$4 sm:$0xff]  }
 0x1df   :  { %1777 = vmatprep.subr.bf16.mxu1 %v4582_v12  ;;  %2211 = vmatprep.subr.bf16.mxu0 %v4585_v14  ;;  %v4653_v11 = vld [vmem:[#allocation5 + $0x3fc] ss:$24 sps:$4 sm:$0xff]   ;;  %v4648_v12 = vld [vmem:[#allocation5 + $0x3f0] ss:$24 sps:$4 sm:$0xff]  }
 0x1e0   :  { %v4651_v14 = vld [vmem:[#allocation5 + $0x3f8] ss:$24 sps:$4 sm:$0xff]  }
 0x1e2   :  { %1778 = vmatpush1.bf16.msra.mxu1 %v4580_v16  ;;  %2212 = vmatpush1.bf16.msra.mxu0 %v4583_v17  ;;  %v4656_v16 = vld [vmem:[#allocation5 + $0x424] ss:$24 sps:$4 sm:$0xff]  }
 0x1e3   :  { %1954 = vmatprep.subr.bf16.mxu1 %v4588_v19  ;;  %4184 = vmatprep.subr.bf16.mxu0 %v4990_v38  ;;  %v4659_v17 = vld [vmem:[#allocation5 + $0x42c] ss:$24 sps:$4 sm:$0xff]   ;;  %v4654_v19 = vld [vmem:[#allocation5 + $0x420] ss:$24 sps:$4 sm:$0xff]  }
 0x1e5   :  { %1780 = vmatmul.mubr.bf16.vlgmr.msra.gmra.mrb[16].mxu1 %v5169_v13  ;;  %2230 = vmatmul.mubr.bf16.vlgmr.msra.gmra.mrb[20].mxu0 %v2035_v20  ;;  %v4600_v13 = vld [vmem:[#allocation7 + $0x1cc] ss:$12 sps:$4 sm:$0xff]  }
 0x1e6   :  { %1955 = vmatpush1.bf16.msra.mxu1 %v4586_v21  ;;  %4185 = vmatpush3.bf16.msra.mxu0 %v4589_v22  ;;  %v4662_v21 = vld [vmem:[#allocation5 + $0x454] ss:$24 sps:$4 sm:$0xff]  }
 0x1e7   :  { %1956 = vmatprep.subr.bf16.mxu1 %v4592_v23  ;;  %4186 = vmatprep.subr.bf16.mxu0 %v4990_v38  ;;  %v4665_v22 = vld [vmem:[#allocation5 + $0x45c] ss:$24 sps:$4 sm:$0xff]   ;;  %v4660_v23 = vld [vmem:[#allocation5 + $0x450] ss:$24 sps:$4 sm:$0xff]  }
 0x1e8   :  { %1986 = vmatprep.mubr.bf16.mxu1 %v4989_v0  ;;  %4200 = vmatprep.mubr.msk.bf16.mxu0 %vm4991_vm0, %v4990_v38 }
 0x1ea   :  { %1957 = vmatpush1.bf16.msra.mxu1 %v4590_v24  ;;  %4187 = vmatpush3.bf16.msra.mxu0 %v4593_v25  ;;  %v4663_v24 = vld [vmem:[#allocation5 + $0x458] ss:$24 sps:$4 sm:$0xff]   ;;  %v4668_v25 = vld [vmem:[#allocation5 + $0x484] ss:$24 sps:$4 sm:$0xff]  }
 0x1eb   :  { %1958 = vmatprep.subr.bf16.mxu1 %v4596_v26  ;;  %4188 = vmatprep.subr.bf16.mxu0 %v4990_v38  ;;  %v4671_v26 = vld [vmem:[#allocation5 + $0x48c] ss:$24 sps:$4 sm:$0xff]  }
 0x1ee   :  { %1959 = vmatpush1.bf16.msra.mxu1 %v4594_v28  ;;  %4189 = vmatpush3.bf16.msra.mxu0 %v4597_v29  ;;  %v4666_v28 = vld [vmem:[#allocation5 + $0x480] ss:$24 sps:$4 sm:$0xff]  }
 0x1ef   :  { %1960 = vmatprep.subr.bf16.mxu1 %v4600_v13  ;;  %4190 = vmatprep.subr.bf16.mxu0 %v4990_v38  ;;  %v4669_v29 = vld [vmem:[#allocation5 + $0x488] ss:$24 sps:$4 sm:$0xff]   ;;  %v4674_v13 = vld [vmem:[#allocation5 + $0x4b4] ss:$24 sps:$4 sm:$0xff]  }
 0x1f2   :  { %1961 = vmatpush1.bf16.msra.mxu1 %v4598_v30  ;;  %4191 = vmatpush3.bf16.msra.mxu0 %v4601_v31  ;;  %v4677_v30 = vld [vmem:[#allocation5 + $0x4bc] ss:$24 sps:$4 sm:$0xff]   ;;  %v4672_v31 = vld [vmem:[#allocation5 + $0x4b0] ss:$24 sps:$4 sm:$0xff]  }
 0x1f3   :  { %1962 = vmatprep.subr.bf16.mxu1 %v4604_v32  ;;  %4192 = vmatprep.subr.bf16.mxu0 %v4990_v38  ;;  %v4675_v32 = vld [vmem:[#allocation5 + $0x4b8] ss:$24 sps:$4 sm:$0xff]  }
 0x1f6   :  { %1963 = vmatpush1.bf16.msra.mxu1 %v4602_v34  ;;  %4193 = vmatpush3.bf16.msra.mxu0 %v4605_v35  ;;  %v4680_v34 = vld [vmem:[#allocation5 + $0x4e4] ss:$24 sps:$4 sm:$0xff]  }
 0x1f7   :  { %1964 = vmatprep.subr.bf16.mxu1 %v4608_v36  ;;  %4194 = vmatprep.subr.bf16.mxu0 %v4990_v38  ;;  %v4683_v35 = vld [vmem:[#allocation5 + $0x4ec] ss:$24 sps:$4 sm:$0xff]   ;;  %v4678_v36 = vld [vmem:[#allocation5 + $0x4e0] ss:$24 sps:$4 sm:$0xff]  }
 0x1fa   :  { %1965 = vmatpush1.bf16.msra.mxu1 %v4606_v37  ;;  %4195 = vmatpush3.bf16.msra.mxu0 %v4609_v40  ;;  %v4681_v37 = vld [vmem:[#allocation5 + $0x4e8] ss:$24 sps:$4 sm:$0xff]   ;;  %v4686_v40 = vld [vmem:[#allocation5 + $0x514] ss:$24 sps:$4 sm:$0xff]  }
 0x1fb   :  { %1966 = vmatprep.subr.bf16.mxu1 %v4612_v41  ;;  %4196 = vmatprep.subr.bf16.mxu0 %v4990_v38  ;;  %v4689_v41 = vld [vmem:[#allocation5 + $0x51c] ss:$24 sps:$4 sm:$0xff]  }
 0x1fe   :  { %1967 = vmatpush1.bf16.msra.mxu1 %v4610_v43  ;;  %4197 = vmatpush3.bf16.msra.mxu0 %v4613_v44  ;;  %v4684_v43 = vld [vmem:[#allocation5 + $0x510] ss:$24 sps:$4 sm:$0xff]  }
 0x1ff   :  { %1968 = vmatprep.subr.bf16.mxu1 %v4616_v46  ;;  %4198 = vmatprep.subr.bf16.mxu0 %v4990_v38  ;;  %v4687_v44 = vld [vmem:[#allocation5 + $0x518] ss:$24 sps:$4 sm:$0xff]  }
 0x202   :  { %1969 = vmatpush1.bf16.msra.mxu1 %v4614_v47  ;;  %4199 = vmatpush3.bf16.msra.mxu0 %v4617_v48  ;;  %v4692_v47 = vld [vmem:[#allocation5 + $0x544] ss:$24 sps:$4 sm:$0xff]  }
 0x203   :  { %2940 = vmatprep.subr.bf16.mxu1 %v4620_v49  ;;  %2981 = vmatprep.subr.bf16.mxu0 %v4623_v50  ;;  %v4695_v48 = vld [vmem:[#allocation5 + $0x54c] ss:$24 sps:$4 sm:$0xff]   ;;  %v4690_v50 = vld [vmem:[#allocation5 + $0x540] ss:$24 sps:$4 sm:$0xff]  }
 0x205   :  { %1987 = vmatmul.mubr.bf16.vlgmr.msra.gmra.mrb[12].mxu1 %v5191_v42  ;;  %4201 = vmatmul.mubr.bf16.vlgmr.msra.gmra.mrb[24].mxu0 %v2035_v20  ;;  %v4633_v42 = vld [vmem:[#allocation5 + $0x368] ss:$24 sps:$4 sm:$0xff]  }
 0x206   :  { %2941 = vmatpush1.bf16.msra.mxu1 %v4618_v52  ;;  %2982 = vmatpush1.bf16.msra.mxu0 %v4621_v45  ;;  %v4657_v20 = vld [vmem:[#allocation5 + $0x428] ss:$24 sps:$4 sm:$0xff]  }
 0x207   :  { %2942 = vmatprep.subr.bf16.mxu1 %v4626_v54  ;;  %2983 = vmatprep.subr.bf16.mxu0 %v4629_v56  ;;  %v4693_v52 = vld [vmem:[#allocation5 + $0x548] ss:$24 sps:$4 sm:$0xff]   ;;  %v4701_v56 = vld [vmem:[#allocation5 + $0x57c] ss:$24 sps:$4 sm:$0xff]  }
 0x20a   :  { %2943 = vmatpush1.bf16.msra.mxu1 %v4624_v53  ;;  %2984 = vmatpush1.bf16.msra.mxu0 %v4627_v55  ;;  %v4698_v53 = vld [vmem:[#allocation5 + $0x574] ss:$24 sps:$4 sm:$0xff]   ;;  %v4696_v55 = vld [vmem:[#allocation5 + $0x570] ss:$24 sps:$4 sm:$0xff]  }
 0x20b   :  { %2944 = vmatprep.subr.bf16.mxu1 %v4632_v60  ;;  %2985 = vmatprep.subr.bf16.mxu0 %v4635_v63  ;;  %v4699_v60 = vld [vmem:[#allocation5 + $0x578] ss:$24 sps:$4 sm:$0xff]   ;;  %v4704_v63 = vld [vmem:[#allocation5 + $0x5a4] ss:$24 sps:$4 sm:$0xff]  }
 0x20e   :  { %2945 = vmatpush1.bf16.msra.mxu1 %v4630_v1  ;;  %2986 = vmatpush1.bf16.msra.mxu0 %v4633_v42  ;;  %v4707_v1 = vld [vmem:[#allocation5 + $0x5ac] ss:$24 sps:$4 sm:$0xff]   ;;  %v4702_v42 = vld [vmem:[#allocation5 + $0x5a0] ss:$24 sps:$4 sm:$0xff]  }
 0x20f   :  { %2946 = vmatprep.subr.bf16.mxu1 %v4638_v3  ;;  %2987 = vmatprep.subr.bf16.mxu0 %v4641_v4  ;;  %v4705_v3 = vld [vmem:[#allocation5 + $0x5a8] ss:$24 sps:$4 sm:$0xff]   ;;  %v4710_v4 = vld [vmem:[#allocation5 + $0x5d4] ss:$24 sps:$4 sm:$0xff]  }
 0x212   :  { %2947 = vmatpush1.bf16.msra.mxu1 %v4636_v5  ;;  %2988 = vmatpush1.bf16.msra.mxu0 %v4639_v6  ;;  %v4713_v5 = vld [vmem:[#allocation5 + $0x5dc] ss:$24 sps:$4 sm:$0xff]   ;;  %v4708_v6 = vld [vmem:[#allocation5 + $0x5d0] ss:$24 sps:$4 sm:$0xff]  }
 0x213   :  { %2948 = vmatprep.subr.bf16.mxu1 %v4644_v51  ;;  %2989 = vmatprep.subr.bf16.mxu0 %v4647_v7  ;;  %v4711_v51 = vld [vmem:[#allocation5 + $0x5d8] ss:$24 sps:$4 sm:$0xff]   ;;  %v4716_v7 = vld [vmem:[#allocation5 + $0x314] ss:$24 sps:$4 sm:$0xff]  }
 0x216   :  { %2949 = vmatpush1.bf16.msra.mxu1 %v4642_v8  ;;  %2990 = vmatpush1.bf16.msra.mxu0 %v4645_v9 }
 0x217   :  { %2950 = vmatprep.subr.bf16.mxu1 %v4650_v10  ;;  %2991 = vmatprep.subr.bf16.mxu0 %v4653_v11 }
 0x21a   :  { %2951 = vmatpush1.bf16.msra.mxu1 %v4648_v12  ;;  %2992 = vmatpush1.bf16.msra.mxu0 %v4651_v14  ;;  %v5223_v12 = vld [vmem:[%s5344_s5 + $0x6] sm:$0x3f] }
 0x21b   :  { %2952 = vmatprep.subr.bf16.mxu1 %v4656_v16  ;;  %2993 = vmatprep.subr.bf16.mxu0 %v4659_v17  ;;  %v1650_v14 = vrot.slane %v5223_v12, %v5132_v59  ;;  %v1654_v16 = vrot.slane %v5223_v12, %v5138_v61 }
 0x21e   :  { %2953 = vmatpush1.bf16.msra.mxu1 %v4654_v19  ;;  %2994 = vmatpush1.bf16.msra.mxu0 %v4657_v20 }
 0x21f   :  { %2954 = vmatprep.subr.bf16.mxu1 %v4662_v21  ;;  %2995 = vmatprep.subr.bf16.mxu0 %v4665_v22 }
 0x222   :  { %2955 = vmatpush1.bf16.msra.mxu1 %v4660_v23  ;;  %2996 = vmatpush1.bf16.msra.mxu0 %v4663_v24 }
 0x223   :  { %2956 = vmatprep.subr.bf16.mxu1 %v4668_v25  ;;  %2997 = vmatprep.subr.bf16.mxu0 %v4671_v26 }
 0x226   :  { %2957 = vmatpush1.bf16.msra.mxu1 %v4666_v28  ;;  %2998 = vmatpush1.bf16.msra.mxu0 %v4669_v29 }
 0x227   :  { %2958 = vmatprep.subr.bf16.mxu1 %v4674_v13  ;;  %2999 = vmatprep.subr.bf16.mxu0 %v4677_v30 }
 0x22a   :  { %2959 = vmatpush1.bf16.msra.mxu1 %v4672_v31  ;;  %3000 = vmatpush1.bf16.msra.mxu0 %v4675_v32 }
 0x22b   :  { %2960 = vmatprep.subr.bf16.mxu1 %v4680_v34  ;;  %3001 = vmatprep.subr.bf16.mxu0 %v4683_v35 }
 0x22e   :  { %2961 = vmatpush1.bf16.msra.mxu1 %v4678_v36  ;;  %3002 = vmatpush1.bf16.msra.mxu0 %v4681_v37  ;;  %v3867_v36 = vld [vmem:[%s5345_s6 + $0x2] sm:$0x3]  ;;  %v1638_v37 = vrot.slane %v5223_v12, %v5141_v62 }
 0x22f   :  { %2962 = vmatprep.subr.bf16.mxu1 %v4686_v40  ;;  %3003 = vmatprep.subr.bf16.mxu0 %v4689_v41  ;;  %v2304_v40 = vrot.slane %v3867_v36, %v5146_v2  ;;  %v1658_v41 = vrot.slane %v5223_v12, %v5158_v33 }
 0x232   :  { %2963 = vmatpush1.bf16.msra.mxu1 %v4684_v43  ;;  %3004 = vmatpush1.bf16.msra.mxu0 %v4687_v44 }
 0x233   :  { %2964 = vmatprep.subr.bf16.mxu1 %v4692_v47  ;;  %3005 = vmatprep.subr.bf16.mxu0 %v4695_v48  ;;  %v1642_v48 = vrot.slane %v5223_v12, %v5146_v2 }
 0x236   :  { %2965 = vmatpush1.bf16.msra.mxu1 %v4690_v50  ;;  %3006 = vmatpush1.bf16.msra.mxu0 %v4693_v52 }
 0x237   :  { %2966 = vmatprep.subr.bf16.mxu1 %v4698_v53  ;;  %3007 = vmatprep.subr.bf16.mxu0 %v4701_v56 }
 0x23a   :  { %2967 = vmatpush1.bf16.msra.mxu1 %v4696_v55  ;;  %3008 = vmatpush1.bf16.msra.mxu0 %v4699_v60 }
 0x23b   :  { %2968 = vmatprep.subr.bf16.mxu1 %v4704_v63  ;;  %3009 = vmatprep.subr.bf16.mxu0 %v4707_v1 }
 0x23e   :  { %2969 = vmatpush1.bf16.msra.mxu1 %v4702_v42  ;;  %3010 = vmatpush1.bf16.msra.mxu0 %v4705_v3 }
 0x23f   :  { %2970 = vmatprep.subr.bf16.mxu1 %v4710_v4  ;;  %3011 = vmatprep.subr.bf16.mxu0 %v4713_v5 }
 0x242   :  { %2971 = vmatpush1.bf16.msra.mxu1 %v4708_v6  ;;  %3012 = vmatpush1.bf16.msra.mxu0 %v4711_v51 }
 0x243   :  { %3022 = vmatprep.subr.bf16.mxu1 %v4716_v7  ;;  %4204 = vmatprep.subr.bf16.mxu0 %v4990_v38 }
 0x278   :  { %v5215_v46 = vpop.f32.mrb[12].mxu0 }
 0x279   :  { %v1742_v49 = vpop.f32.mrb[13].mxu0 }
 0x27a   :  { %v1744_v45 = vpop.f32.mrb[14].mxu0  ;;  %v1743_v17 = vadd.f32 %v1742_v49, %v1650_v14 }
 0x27b   :  { %v1745_v54 = vpop.f32.mrb[15].mxu0 }
 0x298   :  { %v5218_v8 = vpop.f32.mrb[16].mxu0 }
 0x299   :  { %v4182_v9 = vpop.f32.mrb[17].mxu0 }
 0x29a   :  { %v2032_v10 = vpop.f32.mrb[18].mxu0 }
 0x29b   :  { %v4183_v11 = vpop.f32.mrb[19].mxu0 }
 0x2b8   :  { %v1781_v19 = vpop.f32.mrb[16].mxu1  ;;  %v2231_v20 = vpop.f32.mrb[20].mxu0 }
 0x2b9   :  { %v1782_v21 = vadd.f32 %v1781_v19, %v1654_v16  ;;  %v2307_v22 = vadd.f32 %v2231_v20, %v1743_v17  ;;  %v1783_v23 = vpop.f32.mrb[17].mxu1  ;;  %v2233_v24 = vpop.f32.mrb[21].mxu0  ;;  %v1646_v20 = vrot.slane %v5223_v12, %v5151_v27  ;;  %v4717_v12 = vld [vmem:[#allocation7 + $0x308] ss:$12 sps:$4 sm:$0xff]  }
 0x2ba   :  { %v1785_v25 = vpop.f32.mrb[18].mxu1  ;;  %v2235_v26 = vpop.f32.mrb[22].mxu0  ;;  %v1784_v56 = vadd.f32 %v1783_v23, %v1658_v41  ;;  %v4724_v41 = vld [vmem:[#allocation5 + $0x374] ss:$24 sps:$4 sm:$0xff]  }
 0x2bb   :  { %v3918_v28 = vmul.f32 -1.442695, %v2307_v22  ;;  %v2314_v29 = vadd.f32 %v2233_v24, %v1782_v21  ;;  %v1786_v13 = vpop.f32.mrb[19].mxu1  ;;  %v2236_v30 = vpop.f32.mrb[23].mxu0  ;;  %v2278_v22 = vadd.f32 %v3867_v36, %v5218_v8  ;;  %v1741_v24 = vadd.f32 %v5215_v46, %v1646_v20  ;;  %v4761_v20 = vld [vmem:[#allocation7 + $0x3f0] ss:$12 sps:$4 sm:$0xff]  }
 0x2bd   :  { %4846 = vpow2.f32 %v3918_v28  ;;  %v3919_v31 = vmul.f32 -1.442695, %v2314_v29 }
 0x2bf   :  { %4848 = vpow2.f32 %v3919_v31 }
 0x2c7   :  { %v4847_v32 = vpop.eup %4846 }
 0x2c8   :  { %v2311_v34 = vadd.f32 1.0, %v4847_v32  ;;  %v4714_v32 = vld [vmem:[#allocation5 + $0x310] ss:$24 sps:$4 sm:$0xff]  }
 0x2c9   :  { %v4849_v35 = vpop.eup %4848 }
 0x2ca   :  { %4850 = vrcp.f32 %v2311_v34  ;;  %v2318_v43 = vadd.f32 1.0, %v4849_v35  ;;  %v4720_v35 = vld [vmem:[#allocation5 + $0x344] ss:$24 sps:$4 sm:$0xff]  }
 0x2cc   :  { %4852 = vrcp.f32 %v2318_v43  ;;  %v4722_v43 = vld [vmem:[#allocation5 + $0x370] ss:$24 sps:$4 sm:$0xff]  }
 0x2d4   :  { %v4851_v53 = vpop.eup %4850 }
 0x2d6   :  { %v4853_v6 = vpop.eup %4852 }
 0x2d7   :  { %v2324_v9 = vsub.f32 1.0, %v4853_v6  ;;  %v2326_v14 = vmul.f32 %v4853_v6, %v5198_v18 }
 0x2d8   :  { %v1988_v44 = vpop.f32.mrb[12].mxu1  ;;  %v2272_v47 = vpop.f32.mrb[24].mxu0 }
 0x2d9   :  { %v4246_v49 = vadd.f32 %v1988_v44, %v1638_v37  ;;  %v2306_v50 = vadd.f32 %v2304_v40, %v2272_v47  ;;  %v1990_v52 = vpop.f32.mrb[13].mxu1  ;;  %v4202_v45 = vpop.f32.mrb[25].mxu0  ;;  %v4721_v40 = vld [vmem:[#allocation7 + $0x320] ss:$12 sps:$4 sm:$0xff]   ;;  %v4728_v44 = vld [vmem:[#allocation5 + $0x3a4] ss:$24 sps:$4 sm:$0xff]  }
 0x2da   :  { %v1992_v54 = vpop.f32.mrb[14].mxu1  ;;  %v2275_v55 = vpop.f32.mrb[26].mxu0  ;;  %v4247_v3 = vadd.f32 %v1990_v52, %v1642_v48  ;;  %v4726_v47 = vld [vmem:[#allocation5 + $0x3a0] ss:$24 sps:$4 sm:$0xff]   ;;  %v4729_v48 = vld [vmem:[#allocation7 + $0x350] ss:$12 sps:$4 sm:$0xff]  }
 0x2db   :  { %v3916_v60 = vmul.f32 -1.442695, %v4246_v49  ;;  %v2321_v63 = vmul.f32 %v4851_v53, %v2306_v50  ;;  %v1993_v1 = vpop.f32.mrb[15].mxu1  ;;  %v4203_v42 = vpop.f32.mrb[27].mxu0  ;;  %v4732_v49 = vld [vmem:[#allocation5 + $0x3d4] ss:$24 sps:$4 sm:$0xff]  }
 0x2dc   :  { %v3917_v5 = vmul.f32 -1.442695, %v4247_v3  ;;  %v4730_v50 = vld [vmem:[#allocation5 + $0x3d0] ss:$24 sps:$4 sm:$0xff]   ;;  %v4736_v45 = vld [vmem:[#allocation5 + $0x404] ss:$24 sps:$4 sm:$0xff]  }
 0x2dd   :  { %4854 = vpow2.f32 %v3916_v60  ;;  %v2322_v4 = vadd.f32 %v2321_v63, %v1784_v56  ;;  %v4733_v52 = vld [vmem:[#allocation7 + $0x368] ss:$12 sps:$4 sm:$0xff]   ;;  %v4734_v53 = vld [vmem:[#allocation5 + $0x400] ss:$24 sps:$4 sm:$0xff]   ;;  %v4744_v63 = vld [vmem:[#allocation5 + $0x464] ss:$24 sps:$4 sm:$0xff]  }
 0x2de   :  { %v4737_v54 = vld [vmem:[#allocation7 + $0x380] ss:$12 sps:$4 sm:$0xff]   ;;  %v4738_v56 = vld [vmem:[#allocation5 + $0x430] ss:$24 sps:$4 sm:$0xff]   ;;  %v4741_v60 = vld [vmem:[#allocation7 + $0x398] ss:$12 sps:$4 sm:$0xff]  }
 0x2df   :  { %4856 = vtanh.f32 %v2322_v4  ;;  %v4740_v55 = vld [vmem:[#allocation5 + $0x434] ss:$24 sps:$4 sm:$0xff]   ;;  %v4742_v1 = vld [vmem:[#allocation5 + $0x460] ss:$24 sps:$4 sm:$0xff]   ;;  %v4745_v42 = vld [vmem:[#allocation7 + $0x3b0] ss:$12 sps:$4 sm:$0xff]  }
 0x2e0   :  { %4858 = vpow2.f32 %v3917_v5  ;;  %v5263_v3 = vld [vmem:[%s5340_s1 + $0x4] sm:$0x1]  ;;  %v4748_v4 = vld [vmem:[#allocation5 + $0x494] ss:$24 sps:$4 sm:$0xff]  }
 0x2e1   :  { %v4751_v5 = vld [vmem:[#allocation7 + $0x3c4] ss:$12 sps:$4 sm:$0xff]   ;;  %v5268_v6 = vpack.c.bf16 %v5263_v3, %v5263_v3 }
 0x2e7   :  { %v4855_v51 = vpop.eup %4854 }
 0x2e8   :  { %v2283_v7 = vadd.f32 1.0, %v4855_v51  ;;  %v4746_v51 = vld [vmem:[#allocation5 + $0x490] ss:$24 sps:$4 sm:$0xff]  }
 0x2e9   :  { %v4857_v10 = vpop.eup %4856 }
 0x2ea   :  { %4860 = vrcp.f32 %v2283_v7  ;;  %v2325_v11 = vmul.f32 %v4857_v10, %v2324_v9  ;;  %v4859_v17 = vpop.eup %4858  ;;  %v4749_v7 = vld [vmem:[#allocation7 + $0x3c0] ss:$12 sps:$4 sm:$0xff]   ;;  %v4754_v9 = vld [vmem:[#allocation5 + $0x4c4] ss:$24 sps:$4 sm:$0xff]  }
 0x2eb   :  { %v2290_v21 = vadd.f32 1.0, %v4859_v17  ;;  %v4757_v10 = vld [vmem:[#allocation7 + $0x3dc] ss:$12 sps:$4 sm:$0xff]   ;;  %v4763_v17 = vld [vmem:[#allocation7 + $0x3f4] ss:$12 sps:$4 sm:$0xff]  }
 0x2ec   :  { %v2327_v16 = vadd.f32 %v2326_v14, %v2325_v11  ;;  %v4752_v11 = vld [vmem:[#allocation5 + $0x4c0] ss:$24 sps:$4 sm:$0xff]  }
 0x2ed   :  { %4862 = vrcp.f32 %v2290_v21  ;;  %v4755_v14 = vld [vmem:[#allocation7 + $0x3d8] ss:$12 sps:$4 sm:$0xff]  }
 0x2ee   :  { %v2329_v19 = vpack.c.bf16 %v2327_v16, %v2327_v16  ;;  %v3633_v46 = vrot.slane %v2327_v16, 5  ;;  %v4760_v16 = vld [vmem:[#allocation5 + $0x4f4] ss:$24 sps:$4 sm:$0xff]   ;;  %v4766_v21 = vld [vmem:[#allocation5 + $0x524] ss:$24 sps:$4 sm:$0xff]  }
 0x2f0   :  { %2972 = vmatprep.mubr.bf16.mxu1 %v2329_v19  ;;  %3013 = vmatprep.mubr.bf16.mxu0 %v2329_v19 }
 0x2f4   :  { %v4861_v23 = vpop.eup %4860 }
 0x2f5   :  { %v2293_v25 = vmul.f32 %v4861_v23, %v2278_v22  ;;  %v4769_v22 = vld [vmem:[#allocation7 + $0x40c] ss:$12 sps:$4 sm:$0xff]  }
 0x2f6   :  { %v4764_v23 = vld [vmem:[#allocation5 + $0x520] ss:$24 sps:$4 sm:$0xff]  }
 0x2f7   :  { %v2294_v26 = vadd.f32 %v2293_v25, %v1741_v24  ;;  %v4863_v28 = vpop.eup %4862  ;;  %v4767_v24 = vld [vmem:[#allocation7 + $0x408] ss:$12 sps:$4 sm:$0xff]  }
 0x2f8   :  { %v2296_v18 = vsub.f32 1.0, %v4863_v28  ;;  %v2298_v30 = vmul.f32 %v4863_v28, %v5186_v39  ;;  %v4718_v39 = vld [vmem:[#allocation5 + $0x340] ss:$24 sps:$4 sm:$0xff]   ;;  %v4772_v25 = vld [vmem:[#allocation5 + $0x554] ss:$24 sps:$4 sm:$0xff]  }
 0x2f9   :  { %4864 = vtanh.f32 %v2294_v26  ;;  %v4775_v26 = vld [vmem:[#allocation7 + $0x424] ss:$12 sps:$4 sm:$0xff]  }
 0x2fa   :  { %v4770_v28 = vld [vmem:[#allocation5 + $0x550] ss:$24 sps:$4 sm:$0xff]  }
 0x303   :  { %v4865_v29 = vpop.eup %4864 }
 0x304   :  { %v2297_v13 = vmul.f32 %v4865_v29, %v2296_v18  ;;  %v4773_v18 = vld [vmem:[#allocation7 + $0x420] ss:$12 sps:$4 sm:$0xff]   ;;  %v4778_v29 = vld [vmem:[#allocation5 + $0x584] ss:$24 sps:$4 sm:$0xff]  }
 0x306   :  { %v2299_v31 = vadd.f32 %v2298_v30, %v2297_v13  ;;  %v4781_v13 = vld [vmem:[#allocation7 + $0x43c] ss:$12 sps:$4 sm:$0xff]   ;;  %v4776_v30 = vld [vmem:[#allocation5 + $0x580] ss:$24 sps:$4 sm:$0xff]  }
 0x308   :  { %v5245_v34 = vpack.c.bf16 %v2299_v31, %v2299_v31  ;;  %v3630_v8 = vrot.slane %v2299_v31, 6  ;;  %v4779_v31 = vld [vmem:[#allocation7 + $0x438] ss:$12 sps:$4 sm:$0xff]  }
 0x30a   :  { %2973 = vmatmul.mubr.bf16.vlgmr.msra.gmra.mrb[20].mxu1 %v5245_v34  ;;  %v3642_v36 = vsel %vm3641_vm2, %v5171_v15, %v3630_v8  ;;  %3014 = vmatmul.mubr.bf16.vlgmr.msra.gmra.mrb[28].mxu0 %v5245_v34  ;;  %v4725_v15 = vld [vmem:[#allocation7 + $0x338] ss:$12 sps:$4 sm:$0xff]   ;;  %v4782_v8 = vld [vmem:[#allocation5 + $0x5b0] ss:$24 sps:$4 sm:$0xff]  }
 0x30b   :  { %v5250_v37 = vsel %vm3643_vm3, %v3642_v36, %v3633_v46  ;;  %3023 = vmatpush1.bf16.msra.mxu1 %v4714_v32  ;;  %4205 = vmatpush3.bf16.msra.mxu0 %v4717_v12  ;;  %v4784_v32 = vld [vmem:[#allocation5 + $0x5b4] ss:$24 sps:$4 sm:$0xff]   ;;  %v4790_v46 = vld [vmem:[#allocation5 + $0x5e4] ss:$24 sps:$4 sm:$0xff]  }
 0x30c   :  { %3054 = vmatprep.mubr.bf16.mxu1 %v2329_v19  ;;  %3024 = vmatprep.subr.bf16.mxu1 %v4720_v35  ;;  %v4758_v19 = vld [vmem:[#allocation5 + $0x4f0] ss:$24 sps:$4 sm:$0xff]   ;;  %v4787_v12 = vld [vmem:[#allocation7 + $0x454] ss:$12 sps:$4 sm:$0xff]   ;;  %v4793_v36 = vld [vmem:[#allocation7 + $0x46c] ss:$12 sps:$4 sm:$0xff]  }
 0x30d   :  { %4206 = vmatprep.subr.bf16.mxu0 %v4990_v38  ;;  %4220 = vmatprep.mubr.msk.bf16.mxu0 %vm4991_vm0, %v4990_v38  ;;  %v4785_v35 = vld [vmem:[#allocation7 + $0x450] ss:$12 sps:$4 sm:$0xff]  }
 0x30f   :  { %3025 = vmatpush1.bf16.msra.mxu1 %v4718_v39  ;;  %4207 = vmatpush3.bf16.msra.mxu0 %v4721_v40  ;;  %v4788_v39 = vld [vmem:[#allocation5 + $0x5e0] ss:$24 sps:$4 sm:$0xff]   ;;  %v4791_v40 = vld [vmem:[#allocation7 + $0x468] ss:$12 sps:$4 sm:$0xff]  }
 0x310   :  { %3026 = vmatprep.subr.bf16.mxu1 %v4724_v41  ;;  %4208 = vmatprep.subr.bf16.mxu0 %v4990_v38  ;;  %v5275_v41 = vld [vmem:[%s5340_s1 + $0x5] sm:$0x1] }
 0x313   :  { %3027 = vmatpush1.bf16.msra.mxu1 %v4722_v43  ;;  %4209 = vmatpush3.bf16.msra.mxu0 %v4725_v15  ;;  %v4796_v43 = vld [vmem:[#allocation7 + $0x304] ss:$12 sps:$4 sm:$0xff]   ;;  %v3310_v15 = vpack.c.bf16 %v5275_v41, %v5275_v41 }
 0x314   :  { %3028 = vmatprep.subr.bf16.mxu1 %v4728_v44  ;;  %4210 = vmatprep.subr.bf16.mxu0 %v4990_v38  ;;  %v4794_v44 = vld [vmem:[#allocation7 + $0x300] ss:$12 sps:$4 sm:$0xff]  }
 0x317   :  { %3029 = vmatpush1.bf16.msra.mxu1 %v4726_v47  ;;  %4211 = vmatpush3.bf16.msra.mxu0 %v4729_v48  ;;  %v4797_v47 = vld [vmem:[#allocation7 + $0x3c8] ss:$12 sps:$4 sm:$0xff]  }
 0x318   :  { %3030 = vmatprep.subr.bf16.mxu1 %v4732_v49  ;;  %4212 = vmatprep.subr.bf16.mxu0 %v4990_v38  ;;  %v4800_v48 = vld [vmem:[#allocation7 + $0x31c] ss:$12 sps:$4 sm:$0xff]   ;;  %v4798_v49 = vld [vmem:[#allocation7 + $0x318] ss:$12 sps:$4 sm:$0xff]  }
 0x31b   :  { %3031 = vmatpush1.bf16.msra.mxu1 %v4730_v50  ;;  %4213 = vmatpush3.bf16.msra.mxu0 %v4733_v52  ;;  %v4801_v50 = vld [vmem:[#allocation7 + $0x3e0] ss:$12 sps:$4 sm:$0xff]  }
 0x31c   :  { %3032 = vmatprep.subr.bf16.mxu1 %v4736_v45  ;;  %4214 = vmatprep.subr.bf16.mxu0 %v4990_v38  ;;  %v4804_v52 = vld [vmem:[#allocation7 + $0x334] ss:$12 sps:$4 sm:$0xff]   ;;  %v4802_v45 = vld [vmem:[#allocation7 + $0x330] ss:$12 sps:$4 sm:$0xff]  }
 0x31f   :  { %3033 = vmatpush1.bf16.msra.mxu1 %v4734_v53  ;;  %4215 = vmatpush3.bf16.msra.mxu0 %v4737_v54  ;;  %v4805_v53 = vld [vmem:[#allocation7 + $0x3f8] ss:$12 sps:$4 sm:$0xff]   ;;  %v4806_v54 = vld [vmem:[#allocation7 + $0x348] ss:$12 sps:$4 sm:$0xff]  }
 0x320   :  { %3034 = vmatprep.subr.bf16.mxu1 %v4740_v55  ;;  %4216 = vmatprep.subr.bf16.mxu0 %v4990_v38  ;;  %v4809_v55 = vld [vmem:[#allocation7 + $0x410] ss:$12 sps:$4 sm:$0xff]  }
 0x323   :  { %3035 = vmatpush1.bf16.msra.mxu1 %v4738_v56  ;;  %4217 = vmatpush3.bf16.msra.mxu0 %v4741_v60  ;;  %v4812_v56 = vld [vmem:[#allocation7 + $0x364] ss:$12 sps:$4 sm:$0xff]   ;;  %v4813_v60 = vld [vmem:[#allocation7 + $0x428] ss:$12 sps:$4 sm:$0xff]  }
 0x324   :  { %3036 = vmatprep.subr.bf16.mxu1 %v4744_v63  ;;  %4218 = vmatprep.subr.bf16.mxu0 %v4990_v38  ;;  %v4816_v63 = vld [vmem:[#allocation7 + $0x37c] ss:$12 sps:$4 sm:$0xff]  }
 0x327   :  { %3037 = vmatpush1.bf16.msra.mxu1 %v4742_v1  ;;  %4219 = vmatpush3.bf16.msra.mxu0 %v4745_v42  ;;  %v4814_v1 = vld [vmem:[#allocation7 + $0x378] ss:$12 sps:$4 sm:$0xff]   ;;  %v4817_v42 = vld [vmem:[#allocation7 + $0x440] ss:$12 sps:$4 sm:$0xff]  }
 0x328   :  { %3038 = vmatprep.subr.bf16.mxu1 %v4748_v4  ;;  %3472 = vmatprep.subr.bf16.mxu0 %v4751_v5  ;;  %v4820_v4 = vld [vmem:[#allocation7 + $0x394] ss:$12 sps:$4 sm:$0xff]   ;;  %v4818_v5 = vld [vmem:[#allocation7 + $0x390] ss:$12 sps:$4 sm:$0xff]  }
 0x32a   :  { %4221 = vmatmul.mubr.bf16.vlgmr.msra.gmra.mrb[32].mxu0 %v5268_v6 }
 0x32b   :  { %3039 = vmatpush1.bf16.msra.mxu1 %v4746_v51  ;;  %3473 = vmatpush1.bf16.msra.mxu0 %v4749_v7  ;;  %v4821_v51 = vld [vmem:[#allocation7 + $0x458] ss:$12 sps:$4 sm:$0xff]  }
 0x32c   :  { %3040 = vmatprep.subr.bf16.mxu1 %v4754_v9  ;;  %3474 = vmatprep.subr.bf16.mxu0 %v4757_v10  ;;  %v4824_v7 = vld [vmem:[#allocation7 + $0x3ac] ss:$12 sps:$4 sm:$0xff]   ;;  %v4822_v9 = vld [vmem:[#allocation7 + $0x3a8] ss:$12 sps:$4 sm:$0xff]   ;;  %v4825_v10 = vld [vmem:[#allocation7 + $0x470] ss:$12 sps:$4 sm:$0xff]  }
 0x32d   :  { %3504 = vmatprep.mubr.bf16.mxu0 %v4989_v0 }
 0x32f   :  { %3041 = vmatpush1.bf16.msra.mxu1 %v4752_v11  ;;  %3475 = vmatpush1.bf16.msra.mxu0 %v4755_v14 }
 0x330   :  { %3042 = vmatprep.subr.bf16.mxu1 %v4760_v16  ;;  %3476 = vmatprep.subr.bf16.mxu0 %v4763_v17 }
 0x333   :  { %3043 = vmatpush1.bf16.msra.mxu1 %v4758_v19  ;;  %3477 = vmatpush1.bf16.msra.mxu0 %v4761_v20 }
 0x334   :  { %3044 = vmatprep.subr.bf16.mxu1 %v4766_v21  ;;  %3478 = vmatprep.subr.bf16.mxu0 %v4769_v22 }
 0x337   :  { %3045 = vmatpush1.bf16.msra.mxu1 %v4764_v23  ;;  %3479 = vmatpush1.bf16.msra.mxu0 %v4767_v24  ;;  %v5299_v23 = vld [vmem:[%s5344_s5 + $0xc] sm:$0x3f] }
 0x338   :  { %3046 = vmatprep.subr.bf16.mxu1 %v4772_v25  ;;  %3480 = vmatprep.subr.bf16.mxu0 %v4775_v26 }
 0x33b   :  { %3047 = vmatpush1.bf16.msra.mxu1 %v4770_v28  ;;  %3481 = vmatpush1.bf16.msra.mxu0 %v4773_v18 }
 0x33c   :  { %3048 = vmatprep.subr.bf16.mxu1 %v4778_v29  ;;  %3482 = vmatprep.subr.bf16.mxu0 %v4781_v13 }
 0x33f   :  { %3049 = vmatpush1.bf16.msra.mxu1 %v4776_v30  ;;  %3483 = vmatpush1.bf16.msra.mxu0 %v4779_v31 }
 0x340   :  { %3050 = vmatprep.subr.bf16.mxu1 %v4784_v32  ;;  %3484 = vmatprep.subr.bf16.mxu0 %v4787_v12 }
 0x343   :  { %3051 = vmatpush1.bf16.msra.mxu1 %v4782_v8  ;;  %3485 = vmatpush1.bf16.msra.mxu0 %v4785_v35 }
 0x344   :  { %3052 = vmatprep.subr.bf16.mxu1 %v4790_v46  ;;  %3486 = vmatprep.subr.bf16.mxu0 %v4793_v36 }
 0x347   :  { %3053 = vmatpush1.bf16.msra.mxu1 %v4788_v39  ;;  %3487 = vmatpush1.bf16.msra.mxu0 %v4791_v40  ;;  %v4017_v39 = vld [vmem:[%s5345_s6 + $0x4] sm:$0x3]  ;;  %v2913_v40 = vrot.slane %v5299_v23, %v5141_v62  ;;  %s4993_s6 = smov [#allocation8]  }
 0x348   :  { %3229 = vmatprep.subr.bf16.mxu1 %v4796_v43  ;;  %4224 = vmatprep.subr.bf16.mxu0 %v4990_v38  ;;  %v3579_v43 = vrot.slane %v4017_v39, %v5146_v2  ;;  %s3656_s0 = sshll.u32 %s4993_s6, 4  ;;  %s3657_s0 = int_to_ptr.vmem [resolvable:$true] %s3656_s0 }
 0x349   :  { %s4954_s24 = scalar_lea.vmem %s3657_s0, 32  ;;  %p4959_p11 = scmp.lt.s32.totalorder %s3657_s0, %s3657_s0 }
 0x34a   :  { %3055 = vmatmul.mubr.bf16.vlgmr.msra.gmra.mrb[24].mxu1 %v5245_v34  ;;  %3505 = vmatmul.mubr.bf16.vlgmr.msra.gmra.mrb[36].mxu0 %v3310_v15  ;;  %v4808_v34 = vld [vmem:[#allocation7 + $0x34c] ss:$12 sps:$4 sm:$0xff]   ;;  %p4955_p10 = scmp.ne.s32.totalorder %s3657_s0, %s4954_s24  ;;  %p4960_p12 = scmp.lt.s32.totalorder %s4954_s24, %s4954_s24 }
 0x34b   :  { %3230 = vmatpush1.bf16.msra.mxu1 %v4794_v44  ;;  %4225 = vmatpush3.bf16.msra.mxu0 %v4797_v47 }
 0x34c   :  { %3231 = vmatprep.subr.bf16.mxu1 %v4800_v48  ;;  %4226 = vmatprep.subr.bf16.mxu0 %v4990_v38  ;;  %p4961_p13 = por %p4960_p12, %p4959_p11 }
 0x34d   :  { %3261 = vmatprep.mubr.bf16.mxu1 %v4989_v0  ;;  %4240 = vmatprep.mubr.msk.bf16.mxu0 %vm4991_vm0, %v4990_v38  ;;  %v4810_v0 = vld [vmem:[#allocation7 + $0x360] ss:$12 sps:$4 sm:$0xff]  }
 0x34e   :  { %p4962_p0 = pnand %p4961_p13, %p4955_p10 }
 0x34f   :  { %3232 = vmatpush1.bf16.msra.mxu1 %v4798_v49  ;;  %4227 = vmatpush3.bf16.msra.mxu0 %v4801_v50  ;;  %v2917_v49 = vrot.slane %v5299_v23, %v5146_v2 }
 0x350   :  { %3233 = vmatprep.subr.bf16.mxu1 %v4804_v52  ;;  %4228 = vmatprep.subr.bf16.mxu0 %v4990_v38 }
 0x353   :  { %3234 = vmatpush1.bf16.msra.mxu1 %v4802_v45  ;;  %4229 = vmatpush3.bf16.msra.mxu0 %v4805_v53 }
 0x354   :  { %3235 = vmatprep.subr.bf16.mxu1 %v4808_v34  ;;  %4230 = vmatprep.subr.bf16.mxu0 %v4990_v38 }
 0x357   :  { %3236 = vmatpush1.bf16.msra.mxu1 %v4806_v54  ;;  %4231 = vmatpush3.bf16.msra.mxu0 %v4809_v55 }
 0x358   :  { %3237 = vmatprep.subr.bf16.mxu1 %v4812_v56  ;;  %4232 = vmatprep.subr.bf16.mxu0 %v4990_v38 }
 0x35b   :  { %3238 = vmatpush1.bf16.msra.mxu1 %v4810_v0  ;;  %4233 = vmatpush3.bf16.msra.mxu0 %v4813_v60 }
 0x35c   :  { %3239 = vmatprep.subr.bf16.mxu1 %v4816_v63  ;;  %4234 = vmatprep.subr.bf16.mxu0 %v4990_v38 }
 0x35f   :  { %3240 = vmatpush1.bf16.msra.mxu1 %v4814_v1  ;;  %4235 = vmatpush3.bf16.msra.mxu0 %v4817_v42 }
 0x360   :  { %3241 = vmatprep.subr.bf16.mxu1 %v4820_v4  ;;  %4236 = vmatprep.subr.bf16.mxu0 %v4990_v38 }
 0x363   :  { %3242 = vmatpush1.bf16.msra.mxu1 %v4818_v5  ;;  %4237 = vmatpush3.bf16.msra.mxu0 %v4821_v51 }
 0x364   :  { %3243 = vmatprep.subr.bf16.mxu1 %v4824_v7  ;;  %4238 = vmatprep.subr.bf16.mxu0 %v4990_v38  ;;  %v2925_v38 = vrot.slane %v5299_v23, %v5132_v59 }
 0x367   :  { %3244 = vmatpush1.bf16.msra.mxu1 %v4822_v9  ;;  %4239 = vmatpush3.bf16.msra.mxu0 %v4825_v10 }
 0x36a   :  { %3262 = vmatmul.mubr.bf16.vlgmr.msra.gmra.mrb[20].mxu1 %v5268_v6  ;;  %4241 = vmatmul.mubr.bf16.vlgmr.msra.gmra.mrb[40].mxu0 %v3310_v15  ;;  %v2929_v6 = vrot.slane %v5299_v23, %v5138_v61  ;;  %v2933_v15 = vrot.slane %v5299_v23, %v5158_v33 }
 0x3dd   :  { %v5292_v11 = vpop.f32.mrb[28].mxu0 }
 0x3de   :  { %v3017_v14 = vpop.f32.mrb[29].mxu0 }
 0x3df   :  { %v3019_v16 = vpop.f32.mrb[30].mxu0  ;;  %v3018_v24 = vadd.f32 %v3017_v14, %v2925_v38 }
 0x3e0   :  { %v3020_v17 = vpop.f32.mrb[31].mxu0 }
 0x3e1   :  { %v2921_v17 = vrot.slane %v5299_v23, %v5151_v27 }
 0x3e3   :  { %v3016_v38 = vadd.f32 %v5292_v11, %v2921_v17 }
 0x3fd   :  { %v5294_v19 = vpop.f32.mrb[32].mxu0 }
 0x3fe   :  { %v4222_v20 = vpop.f32.mrb[33].mxu0 }
 0x3ff   :  { %v3307_v21 = vpop.f32.mrb[34].mxu0 }
 0x400   :  { %v4223_v22 = vpop.f32.mrb[35].mxu0  ;;  %v3553_v21 = vadd.f32 %v4017_v39, %v5294_v19 }
 0x41d   :  { %v3056_v25 = vpop.f32.mrb[24].mxu1  ;;  %v3506_v26 = vpop.f32.mrb[36].mxu0 }
 0x41e   :  { %v3057_v28 = vadd.f32 %v3056_v25, %v2929_v6  ;;  %v3582_v18 = vadd.f32 %v3506_v26, %v3018_v24  ;;  %v3058_v29 = vpop.f32.mrb[25].mxu1  ;;  %v3508_v13 = vpop.f32.mrb[37].mxu0  ;;  %v4992_v25 = vmov 1966171168  }
 0x41f   :  { %v3060_v30 = vpop.f32.mrb[26].mxu1  ;;  %v3510_v31 = vpop.f32.mrb[38].mxu0  ;;  %v3059_v56 = vadd.f32 %v3058_v29, %v2933_v15  ;;  %v3607_v26 = vunpack.c.l.s4 %v4992_v25 }
 0x420   :  { %v4068_v32 = vmul.f32 -1.442695, %v3582_v18  ;;  %v3589_v12 = vadd.f32 %v3508_v13, %v3057_v28  ;;  %v3061_v8 = vpop.f32.mrb[27].mxu1  ;;  %v3511_v35 = vpop.f32.mrb[39].mxu0 }
 0x422   :  { %4866 = vpow2.f32 %v4068_v32  ;;  %v4069_v46 = vmul.f32 -1.442695, %v3589_v12 }
 0x424   :  { %4868 = vpow2.f32 %v4069_v46 }
 0x42c   :  { %v4867_v36 = vpop.eup %4866 }
 0x42d   :  { %v3586_v59 = vadd.f32 1.0, %v4867_v36 }
 0x42e   :  { %v4869_v61 = vpop.eup %4868 }
 0x42f   :  { %4870 = vrcp.f32 %v3586_v59  ;;  %v3593_v44 = vadd.f32 1.0, %v4869_v61 }
 0x431   :  { %4872 = vrcp.f32 %v3593_v44 }
 0x439   :  { %v4871_v34 = vpop.eup %4870 }
 0x43b   :  { %v4873_v2 = vpop.eup %4872 }
 0x43c   :  { %v3599_v5 = vsub.f32 1.0, %v4873_v2  ;;  %v3601_v10 = vmul.f32 %v4873_v2, %v5275_v41  ;;  %v3608_v41 = vunpack.c.0.s8 %v3607_v26 }
 0x43d   :  { %v3263_v47 = vpop.f32.mrb[20].mxu1  ;;  %v3547_v48 = vpop.f32.mrb[40].mxu0 }
 0x43e   :  { %v4248_v50 = vadd.f32 %v3263_v47, %v2913_v40  ;;  %v3581_v52 = vadd.f32 %v3579_v43, %v3547_v48  ;;  %v3265_v45 = vpop.f32.mrb[21].mxu1  ;;  %v4242_v53 = vpop.f32.mrb[41].mxu0  ;;  %v3611_v23 = vsub.s32 %v3608_v41, %v5129_v58 }
 0x43f   :  { %v3267_v54 = vpop.f32.mrb[22].mxu1  ;;  %v3550_v55 = vpop.f32.mrb[42].mxu0  ;;  %v4249_v33 = vadd.f32 %v3265_v45, %v2917_v49 }
 0x440   :  { %v4066_v62 = vmul.f32 -1.442695, %v4248_v50  ;;  %v3596_v0 = vmul.f32 %v4871_v34, %v3581_v52  ;;  %v3268_v60 = vpop.f32.mrb[23].mxu1  ;;  %v4243_v63 = vpop.f32.mrb[43].mxu0 }
 0x441   :  { %v4067_v42 = vmul.f32 -1.442695, %v4249_v33 }
 0x442   :  { %4874 = vpow2.f32 %v4066_v62  ;;  %v3597_v1 = vadd.f32 %v3596_v0, %v3059_v56 }
 0x444   :  { %4876 = vtanh.f32 %v3597_v1 }
 0x445   :  { %4878 = vpow2.f32 %v4067_v42 }
 0x44c   :  { %v4875_v4 = vpop.eup %4874 }
 0x44d   :  { %v3558_v51 = vadd.f32 1.0, %v4875_v4 }
 0x44e   :  { %v4877_v7 = vpop.eup %4876 }
 0x44f   :  { %4880 = vrcp.f32 %v3558_v51  ;;  %v3600_v9 = vmul.f32 %v4877_v7, %v3599_v5  ;;  %v4879_v16 = vpop.eup %4878 }
 0x450   :  { %v3565_v20 = vadd.f32 1.0, %v4879_v16 }
 0x451   :  { %v3602_v14 = vadd.f32 %v3601_v10, %v3600_v9 }
 0x452   :  { %4882 = vrcp.f32 %v3565_v20 }
 0x453   :  { %v3637_v11 = vrot.slane %v3602_v14, 3 }
 0x459   :  { %v4881_v22 = vpop.eup %4880 }
 0x45a   :  { %v3568_v6 = vmul.f32 %v4881_v22, %v3553_v21 }
 0x45c   :  { %v3569_v24 = vadd.f32 %v3568_v6, %v3016_v38  ;;  %v4883_v28 = vpop.eup %4882 }
 0x45d   :  { %v3571_v18 = vsub.f32 1.0, %v4883_v28  ;;  %v3573_v30 = vmul.f32 %v4883_v28, %v5263_v3 }
 0x45e   :  { %4884 = vtanh.f32 %v3569_v24 }
 0x468   :  { %v4885_v29 = vpop.eup %4884 }
 0x469   :  { %v3572_v13 = vmul.f32 %v4885_v29, %v3571_v18 }
 0x46b   :  { %v3574_v27 = vadd.f32 %v3573_v30, %v3572_v13 }
 0x46d   :  { %v3605_v19 = vcombine.low %v3574_v27, %v3602_v14  ;;  %v3635_v31 = vrot.slane %v3574_v27, 4 }
 0x46f   :  { %v3612_v32 = vrot.slane %v3605_v19, %v3611_v23  ;;  %v3646_v12 = vsel %vm3645_vm4, %v5250_v37, %v3635_v31 }
 0x470   :  { %v3648_v8 = vsel %vm3647_vm5, %v3646_v12, %v3637_v11 }
 0x471   :  { %v3619_v35 = vrot.slane %v3612_v32, %v3611_v23  ;;  %3649 = vst [vmem:[%s5347_s8] sm:$0x3f] %v3648_v8 }
 0x473   :  { %3625 = vst.msk [vmem:[#allocation8] sm:$0x3] %vm3623_vm6, %v3619_v35 }
 0x474   :  { %4965 = shalt.err (!%p4962_p0)
}
 0x475   :  { %s4966_s27 = scalar_lea.hbm %s5346_s7, 32 }
 0x476   :  { %p4967_p1 = scmp.ne.s32.totalorder %s5346_s7, %s4966_s27  ;;  %p4970_p2 = scmp.lt.u32.totalorder %s4966_s27, %s5346_s7 }
 0x478   :  { %p4972_p3 = pnand %p4970_p2, %p4967_p1 }
 0x47a   :  { %4975 = shalt.err (!%p4972_p3)
}
 0x47b   :  { %3659 = dma.vmem_to_hbm [thread:$0]  %s3657_s0, 32, %s5346_s7, [#allocation4]  }
 0x47c   :  { %4980 = dma.done.wait [#allocation4], 32  }
 0x47d   :  { %4981 = vsyncadd [#allocation4], 4294967264 }
 0x47e   :  { %3667 = vsyncpa [#allocation3], 1 }
 0x47f   :  { %3668 = vsyncpa [#allocation6], 1 }
 0x480   :  { %3669 = vsyncpa [#allocation4], 1 }

</bundles_post_ra>
